<compile_context>
chip_gen: v7x
topology: tpu7x:2x2x1
jax: 0.10.0
libtpu: 0.0.40
codegen_flags: <defaults>
</compile_context>

<pallas_src>
import functools

import jax
import jax.numpy as jnp
from jax.experimental import pallas as pl
from jax.experimental.pallas import tpu as pltpu


# ----------------------------------------------------------------------------
# Fixed DQN-style network spec and derived shapes
# ----------------------------------------------------------------------------
CIN, H_IN, W_IN = 4, 16, 16            # input: 4 stacked frames, 16x16
C1, KH1, ST1 = 8, 4, 2                 # conv1: 4->8, 4x4, stride 2
C2, KH2, ST2 = 16, 3, 1                # conv2: 8->16, 3x3, stride 1
H1 = (H_IN - KH1) // ST1 + 1           # 7
W1 = (W_IN - KH1) // ST1 + 1           # 7
H2 = (H1 - KH2) // ST2 + 1             # 5
W2 = (W1 - KH2) // ST2 + 1             # 5
FEAT = C2 * H2 * W2                    # 400 (PyTorch NCHW flatten length)
HIDDEN = 32
NUM_ACTIONS = 18
K1 = KH1 * KH1 * CIN                   # 64: conv1 im2col contraction dim
K2 = KH2 * KH2 * C1                    # 72: conv2 im2col contraction dim


# ----------------------------------------------------------------------------
# Fused kernel: conv1 -> conv2 -> fc4 -> fc5, all in VMEM, four MXU dots total.
#
# Layouts (all activations batch-minor, channels-last):
#   p1    : [H1*W1*B, K1]      rows (i1, j1, b), K ordered (kh, kw, cin)
#   h1_s  : [51*B,   C1] bf16  rows (i1, j1, b) + zero pad (wrap rows for taps)
#   p2_s  : [H2*W1*B, K2] bf16 conv2 im2col, rows (i2, j_full, b), K (di,dj,c1)
#   h2_s  : [H2*W1*B, C2] bf16 conv2 output on the full-width row space
#   phi_s : [B, FEAT]     bf16 fc4 input, columns ((i2*W2+j2)*C2 + c2)
#   w2    : [K2, C2]           rows ordered (di, dj, c1)
#   w4    : [FEAT, HIDDEN]     rows reordered to (i2, j2, c2) at pack time
# ----------------------------------------------------------------------------
def _dqn_fused_kernel(p1_ref, w1_ref, b1_ref, w2_ref, b2_ref, w4_ref, b4_ref,
                      w5_ref, b5_ref, q_ref, h1_s, p2_s, h2_s, phi_s, *, batch):
    n1 = H1 * W1 * batch               # valid conv1 rows
    r2 = H2 * W1 * batch               # conv2 full-width output rows

    # ---- conv1 + ReLU: ONE im2col matmul over every output position ---------
    h1 = jnp.dot(p1_ref[...], w1_ref[...], preferred_element_type=jnp.float32)
    h1 = jnp.maximum(h1 + b1_ref[...], 0.0)          # f32 epilogue (v5e-safe)
    h1_s[...] = jnp.zeros(h1_s.shape, h1_s.dtype)     # zero the wrap/pad rows
    h1_s[pl.ds(0, n1), :] = h1.astype(h1_s.dtype)     # single bf16 cast + store

    # ---- conv2 + ReLU: taps folded into K (one dot, no add chain) -----------
    # For tap (di, dj) the source rows for every full-width output row are one
    # contiguous slice of h1_s, so the im2col is 9 plain stores.
    for di in range(KH2):
        for dj in range(KH2):
            t = di * KH2 + dj
            off = (di * W1 + dj) * batch
            p2_s[:, pl.ds(t * C1, C1)] = h1_s[pl.ds(off, r2), :]

    h2 = jnp.dot(p2_s[...], w2_ref[...], preferred_element_type=jnp.float32)
    h2 = jnp.maximum(h2 + b2_ref[...], 0.0)           # f32 epilogue
    h2_s[...] = h2.astype(h2_s.dtype)                 # single bf16 cast + store

    # ---- fc4 flatten: valid (i2, j2) blocks -> lane-dense [B, FEAT] ----------
    # Garbage full-width columns (j_full >= W2) are simply never copied.
    for i2 in range(H2):
        for j2 in range(W2):
            pos = i2 * W2 + j2
            src = (i2 * W1 + j2) * batch
            phi_s[:, pl.ds(pos * C2, C2)] = h2_s[pl.ds(src, batch), :]

    # ---- fc4 + ReLU: one [B, 400] x [400, 32] dot ----------------------------
    phi = jnp.dot(phi_s[...], w4_ref[...], preferred_element_type=jnp.float32)
    phi = jnp.maximum(phi + b4_ref[...], 0.0)

    # ---- fc5 (Q head), no activation ----------------------------------------
    q = jnp.dot(phi.astype(jnp.bfloat16), w5_ref[...],
                preferred_element_type=jnp.float32) + b5_ref[...]
    q_ref[...] = q.astype(q_ref.dtype)


# ----------------------------------------------------------------------------
# Forward wrapper: one tiny XLA copy-fusion (conv1 im2col) + one pallas_call
# ----------------------------------------------------------------------------
def deep_q_network_forward(params, x_nchw):
    batch = x_nchw.shape[0]

    # conv1 im2col patches, rows ordered (i1, j1, b), K ordered (kh, kw, cin).
    # TODO(synk): at replay batches >=256 build these patches in-kernel from x
    #             (cuts input HBM traffic ~3x) and add a parallel batch grid.
    x_nhwc = jnp.transpose(x_nchw, (0, 2, 3, 1))                       # [B, H, W, Cin]
    cols = []
    for di in range(KH1):
        for dj in range(KH1):
            cols.append(x_nhwc[:, di:di + ST1 * H1:ST1, dj:dj + ST1 * W1:ST1, :])
    p = jnp.concatenate(cols, axis=-1)                                 # [B, H1, W1, K1]
    p = jnp.transpose(p, (1, 2, 0, 3)).reshape(H1 * W1 * batch, K1)
    p1 = p.astype(jnp.bfloat16)

    # h1 pad rows: largest tap offset + full-width conv2 row count.
    h1_rows = ((KH2 - 1) * (W1 + 1) + H2 * W1) * batch                 # 51 * B
    r2 = H2 * W1 * batch                                               # 35 * B

    flops = 2 * batch * (H1 * W1 * K1 * C1
                         + H2 * W1 * K2 * C2
                         + FEAT * HIDDEN
                         + HIDDEN * NUM_ACTIONS)
    param_bytes = sum(int(v.size) * v.dtype.itemsize for v in params.values())
    bytes_accessed = int(p1.size) * p1.dtype.itemsize + param_bytes \
        + batch * NUM_ACTIONS * 4

    kernel = functools.partial(_dqn_fused_kernel, batch=batch)
    q = pl.pallas_call(
        kernel,
        out_shape=jax.ShapeDtypeStruct((batch, NUM_ACTIONS), jnp.float32),
        in_specs=[pl.BlockSpec(memory_space=pltpu.MemorySpace.VMEM)] * 9,
        out_specs=pl.BlockSpec(memory_space=pltpu.MemorySpace.VMEM),
        scratch_shapes=[
            pltpu.VMEM((h1_rows, C1), jnp.bfloat16),    # conv1 activations (+pad)
            pltpu.VMEM((r2, K2), jnp.bfloat16),          # conv2 im2col
            pltpu.VMEM((r2, C2), jnp.bfloat16),          # conv2 activations
            pltpu.VMEM((batch, FEAT), jnp.bfloat16),     # fc4 input (lane-dense)
        ],
        cost_estimate=pl.CostEstimate(flops=flops, transcendentals=0,
                                      bytes_accessed=bytes_accessed),
    )(p1, params["w1"], params["b1"], params["w2"], params["b2"],
      params["w4"], params["b4"], params["w5"], params["b5"])
    return q


# ----------------------------------------------------------------------------
# Parameters: raw PyTorch-layout tensors (deterministic, synthetic), then a
# one-time repack into kernel-friendly layouts (done at init, not per forward).
# ----------------------------------------------------------------------------
def init_raw_params(key):
    ks = jax.random.split(key, 8)

    def u(k, shape, fan_in):
        bound = 1.0 / jnp.sqrt(fan_in)
        return jax.random.uniform(k, shape, jnp.float32, -bound, bound)

    return dict(
        w1=u(ks[0], (C1, CIN, KH1, KH1), CIN * KH1 * KH1),   # [Cout, Cin, kh, kw]
        b1=u(ks[1], (C1,), CIN * KH1 * KH1),
        w2=u(ks[2], (C2, C1, KH2, KH2), C1 * KH2 * KH2),
        b2=u(ks[3], (C2,), C1 * KH2 * KH2),
        w4=u(ks[4], (FEAT, HIDDEN), FEAT),                   # rows in NCHW-flatten order
        b4=u(ks[5], (HIDDEN,), FEAT),
        w5=u(ks[6], (HIDDEN, NUM_ACTIONS), HIDDEN),
        b5=u(ks[7], (NUM_ACTIONS,), HIDDEN),
    )


def pack_params(raw):
    # conv1 weight -> [K1, C1], K ordered (kh, kw, cin), matching the patches.
    w1 = raw["w1"].transpose(2, 3, 1, 0).reshape(K1, C1)
    # conv2 weight -> [K2, C2], rows ordered (di, dj, c1), matching p2_s columns.
    w2 = raw["w2"].transpose(2, 3, 1, 0).reshape(K2, C2)
    # fc4 weight: PyTorch flattens NCHW (c, i, j); regroup rows to (i, j, c) so
    # the kernel's lane-dense flatten needs no transpose.
    w4 = raw["w4"].reshape(C2, H2, W2, HIDDEN).transpose(1, 2, 0, 3).reshape(FEAT, HIDDEN)
    return dict(
        w1=w1.astype(jnp.bfloat16), b1=raw["b1"].reshape(1, C1),
        w2=w2.astype(jnp.bfloat16), b2=raw["b2"].reshape(1, C2),
        w4=w4.astype(jnp.bfloat16), b4=raw["b4"].reshape(1, HIDDEN),
        w5=raw["w5"].astype(jnp.bfloat16), b5=raw["b5"].reshape(1, NUM_ACTIONS),
    )


# ----------------------------------------------------------------------------
# Pure-JAX (f32, PyTorch-layout) reference for a correctness check
# ----------------------------------------------------------------------------
def reference_forward(raw, x_nchw):
    dn = ("NCHW", "OIHW", "NCHW")
    h = jax.lax.conv_general_dilated(x_nchw, raw["w1"], (ST1, ST1), "VALID",
                                     dimension_numbers=dn)
    h = jax.nn.relu(h + raw["b1"][None, :, None, None])
    h = jax.lax.conv_general_dilated(h, raw["w2"], (ST2, ST2), "VALID",
                                     dimension_numbers=dn)
    h = jax.nn.relu(h + raw["b2"][None, :, None, None])
    phi = h.reshape(h.shape[0], -1)                    # PyTorch view(B, -1) on NCHW
    phi = jax.nn.relu(phi @ raw["w4"] + raw["b4"])
    return phi @ raw["w5"] + raw["b5"]                 # fc5 Q head


if __name__ == "__main__":
    key = jax.random.PRNGKey(0)
    k_x, k_p = jax.random.split(key)

    B = 2
    x = jax.random.normal(k_x, (B, CIN, H_IN, W_IN), jnp.float32)   # NCHW input

    raw = init_raw_params(k_p)
    params = pack_params(raw)

    fwd = jax.jit(deep_q_network_forward)
    q = jax.block_until_ready(fwd(params, x))

    assert q.shape == (B, NUM_ACTIONS), q.shape
    assert bool(jnp.all(jnp.isfinite(q)))

    # Note: weights/activations are bf16 inside the kernel, so parity with the
    # f32 reference is ~1e-2 level; tolerance reflects that (fine for DQN).
    q_ref = reference_forward(raw, x)
    err = float(jnp.max(jnp.abs(q - q_ref.astype(jnp.float32))))
    assert err < 5e-2, f"max abs error vs reference: {err}"

    print("KERNEL_OK")
</pallas_src>

<mosaic_0001>
module attributes {stable_mosaic.version = 11 : i64} {
  func.func @_dqn_fused_kernel(%arg0: memref<98x64xbf16, #tpu.memory_space<vmem>>, %arg1: memref<64x8xbf16, #tpu.memory_space<vmem>>, %arg2: memref<1x8xf32, #tpu.memory_space<vmem>>, %arg3: memref<72x16xbf16, #tpu.memory_space<vmem>>, %arg4: memref<1x16xf32, #tpu.memory_space<vmem>>, %arg5: memref<400x32xbf16, #tpu.memory_space<vmem>>, %arg6: memref<1x32xf32, #tpu.memory_space<vmem>>, %arg7: memref<32x18xbf16, #tpu.memory_space<vmem>>, %arg8: memref<1x18xf32, #tpu.memory_space<vmem>>, %arg9: memref<2x18xf32, #tpu.memory_space<vmem>>, %arg10: memref<102x8xbf16, #tpu.memory_space<vmem>>, %arg11: memref<70x72xbf16, #tpu.memory_space<vmem>>, %arg12: memref<70x16xbf16, #tpu.memory_space<vmem>>, %arg13: memref<2x400xbf16, #tpu.memory_space<vmem>>) attributes {dimension_semantics = [], scalar_prefetch = 0 : i64, scratch_operands = 4 : i64, tpu.core_type = #tpu.core_type<tc>} {
    %c0 = arith.constant 0 : index
    %c0_0 = arith.constant 0 : index
    %0 = vector.load %arg0[%c0, %c0_0] : memref<98x64xbf16, #tpu.memory_space<vmem>>, vector<98x64xbf16>
    %c0_1 = arith.constant 0 : index
    %c0_2 = arith.constant 0 : index
    %1 = vector.load %arg1[%c0_1, %c0_2] : memref<64x8xbf16, #tpu.memory_space<vmem>>, vector<64x8xbf16>
    %cst = arith.constant dense<0.000000e+00> : vector<98x8xf32>
    %2 = tpu.matmul %0, %1, %cst {dimension_numbers = #tpu.dot_dimension_numbers<[1], [0], [0], [1], [0, 0, 1, 1], [], []>} : vector<98x64xbf16>, vector<64x8xbf16>, vector<98x8xf32> -> vector<98x8xf32>
    %c0_3 = arith.constant 0 : index
    %c0_4 = arith.constant 0 : index
    %3 = vector.load %arg2[%c0_3, %c0_4] : memref<1x8xf32, #tpu.memory_space<vmem>>, vector<1x8xf32>
    %4 = vector.broadcast %3 : vector<1x8xf32> to vector<98x8xf32>
    %5 = arith.addf %2, %4 : vector<98x8xf32>
    %cst_5 = arith.constant 0.000000e+00 : f32
    %6 = vector.broadcast %cst_5 : f32 to vector<98x8xf32>
    %7 = arith.maximumf %5, %6 : vector<98x8xf32>
    %cst_6 = arith.constant 0.000000e+00 : bf16
    %8 = vector.broadcast %cst_6 : bf16 to vector<102x8xbf16>
    %c0_7 = arith.constant 0 : index
    %c0_8 = arith.constant 0 : index
    %9 = vector.load %arg10[%c0_7, %c0_8] : memref<102x8xbf16, #tpu.memory_space<vmem>>, vector<102x8xbf16>
    tpu.vector_store %arg10[%c0_7, %c0_8], %8 {strides = array<i32>} : memref<102x8xbf16, #tpu.memory_space<vmem>>, vector<102x8xbf16>,
    %10 = arith.truncf %7 : vector<98x8xf32> to vector<98x8xbf16>
    %c0_9 = arith.constant 0 : index
    %c0_10 = arith.constant 0 : index
    %11 = vector.load %arg10[%c0_9, %c0_10] : memref<102x8xbf16, #tpu.memory_space<vmem>>, vector<98x8xbf16>
    tpu.vector_store %arg10[%c0_9, %c0_10], %10 {strides = array<i32>} : memref<102x8xbf16, #tpu.memory_space<vmem>>, vector<98x8xbf16>,
    %c0_11 = arith.constant 0 : index
    %c0_12 = arith.constant 0 : index
    %12 = vector.load %arg10[%c0_11, %c0_12] : memref<102x8xbf16, #tpu.memory_space<vmem>>, vector<70x8xbf16>
    %c0_13 = arith.constant 0 : index
    %c0_14 = arith.constant 0 : index
    %13 = vector.load %arg11[%c0_13, %c0_14] : memref<70x72xbf16, #tpu.memory_space<vmem>>, vector<70x8xbf16>
    tpu.vector_store %arg11[%c0_13, %c0_14], %12 {strides = array<i32>} : memref<70x72xbf16, #tpu.memory_space<vmem>>, vector<70x8xbf16>,
    %c2 = arith.constant 2 : index
    %c0_15 = arith.constant 0 : index
    %14 = vector.load %arg10[%c2, %c0_15] : memref<102x8xbf16, #tpu.memory_space<vmem>>, vector<70x8xbf16>
    %c0_16 = arith.constant 0 : index
    %c8 = arith.constant 8 : index
    %15 = vector.load %arg11[%c0_16, %c8] : memref<70x72xbf16, #tpu.memory_space<vmem>>, vector<70x8xbf16>
    tpu.vector_store %arg11[%c0_16, %c8], %14 {strides = array<i32>} : memref<70x72xbf16, #tpu.memory_space<vmem>>, vector<70x8xbf16>,
    %c4 = arith.constant 4 : index
    %c0_17 = arith.constant 0 : index
    %16 = vector.load %arg10[%c4, %c0_17] : memref<102x8xbf16, #tpu.memory_space<vmem>>, vector<70x8xbf16>
    %c0_18 = arith.constant 0 : index
    %c16 = arith.constant 16 : index
    %17 = vector.load %arg11[%c0_18, %c16] : memref<70x72xbf16, #tpu.memory_space<vmem>>, vector<70x8xbf16>
    tpu.vector_store %arg11[%c0_18, %c16], %16 {strides = array<i32>} : memref<70x72xbf16, #tpu.memory_space<vmem>>, vector<70x8xbf16>,
    %c14 = arith.constant 14 : index
    %c0_19 = arith.constant 0 : index
    %18 = vector.load %arg10[%c14, %c0_19] : memref<102x8xbf16, #tpu.memory_space<vmem>>, vector<70x8xbf16>
    %c0_20 = arith.constant 0 : index
    %c24 = arith.constant 24 : index
    %19 = vector.load %arg11[%c0_20, %c24] : memref<70x72xbf16, #tpu.memory_space<vmem>>, vector<70x8xbf16>
    tpu.vector_store %arg11[%c0_20, %c24], %18 {strides = array<i32>} : memref<70x72xbf16, #tpu.memory_space<vmem>>, vector<70x8xbf16>,
    %c16_21 = arith.constant 16 : index
    %c0_22 = arith.constant 0 : index
    %20 = vector.load %arg10[%c16_21, %c0_22] : memref<102x8xbf16, #tpu.memory_space<vmem>>, vector<70x8xbf16>
    %c0_23 = arith.constant 0 : index
    %c32 = arith.constant 32 : index
    %21 = vector.load %arg11[%c0_23, %c32] : memref<70x72xbf16, #tpu.memory_space<vmem>>, vector<70x8xbf16>
    tpu.vector_store %arg11[%c0_23, %c32], %20 {strides = array<i32>} : memref<70x72xbf16, #tpu.memory_space<vmem>>, vector<70x8xbf16>,
    %c18 = arith.constant 18 : index
    %c0_24 = arith.constant 0 : index
    %22 = vector.load %arg10[%c18, %c0_24] : memref<102x8xbf16, #tpu.memory_space<vmem>>, vector<70x8xbf16>
    %c0_25 = arith.constant 0 : index
    %c40 = arith.constant 40 : index
    %23 = vector.load %arg11[%c0_25, %c40] : memref<70x72xbf16, #tpu.memory_space<vmem>>, vector<70x8xbf16>
    tpu.vector_store %arg11[%c0_25, %c40], %22 {strides = array<i32>} : memref<70x72xbf16, #tpu.memory_space<vmem>>, vector<70x8xbf16>,
    %c28 = arith.constant 28 : index
    %c0_26 = arith.constant 0 : index
    %24 = vector.load %arg10[%c28, %c0_26] : memref<102x8xbf16, #tpu.memory_space<vmem>>, vector<70x8xbf16>
    %c0_27 = arith.constant 0 : index
    %c48 = arith.constant 48 : index
    %25 = vector.load %arg11[%c0_27, %c48] : memref<70x72xbf16, #tpu.memory_space<vmem>>, vector<70x8xbf16>
    tpu.vector_store %arg11[%c0_27, %c48], %24 {strides = array<i32>} : memref<70x72xbf16, #tpu.memory_space<vmem>>, vector<70x8xbf16>,
    %c30 = arith.constant 30 : index
    %c0_28 = arith.constant 0 : index
    %26 = vector.load %arg10[%c30, %c0_28] : memref<102x8xbf16, #tpu.memory_space<vmem>>, vector<70x8xbf16>
    %c0_29 = arith.constant 0 : index
    %c56 = arith.constant 56 : index
    %27 = vector.load %arg11[%c0_29, %c56] : memref<70x72xbf16, #tpu.memory_space<vmem>>, vector<70x8xbf16>
    tpu.vector_store %arg11[%c0_29, %c56], %26 {strides = array<i32>} : memref<70x72xbf16, #tpu.memory_space<vmem>>, vector<70x8xbf16>,
    %c32_30 = arith.constant 32 : index
    %c0_31 = arith.constant 0 : index
    %28 = vector.load %arg10[%c32_30, %c0_31] : memref<102x8xbf16, #tpu.memory_space<vmem>>, vector<70x8xbf16>
    %c0_32 = arith.constant 0 : index
    %c64 = arith.constant 64 : index
    %29 = vector.load %arg11[%c0_32, %c64] : memref<70x72xbf16, #tpu.memory_space<vmem>>, vector<70x8xbf16>
    tpu.vector_store %arg11[%c0_32, %c64], %28 {strides = array<i32>} : memref<70x72xbf16, #tpu.memory_space<vmem>>, vector<70x8xbf16>,
    %c0_33 = arith.constant 0 : index
    %c0_34 = arith.constant 0 : index
    %30 = vector.load %arg11[%c0_33, %c0_34] : memref<70x72xbf16, #tpu.memory_space<vmem>>, vector<70x72xbf16>
    %c0_35 = arith.constant 0 : index
    %c0_36 = arith.constant 0 : index
    %31 = vector.load %arg3[%c0_35, %c0_36] : memref<72x16xbf16, #tpu.memory_space<vmem>>, vector<72x16xbf16>
    %cst_37 = arith.constant dense<0.000000e+00> : vector<70x16xf32>
    %32 = tpu.matmul %30, %31, %cst_37 {dimension_numbers = #tpu.dot_dimension_numbers<[1], [0], [0], [1], [0, 0, 1, 1], [], []>} : vector<70x72xbf16>, vector<72x16xbf16>, vector<70x16xf32> -> vector<70x16xf32>
    %c0_38 = arith.constant 0 : index
    %c0_39 = arith.constant 0 : index
    %33 = vector.load %arg4[%c0_38, %c0_39] : memref<1x16xf32, #tpu.memory_space<vmem>>, vector<1x16xf32>
    %34 = vector.broadcast %33 : vector<1x16xf32> to vector<70x16xf32>
    %35 = arith.addf %32, %34 : vector<70x16xf32>
    %cst_40 = arith.constant 0.000000e+00 : f32
    %36 = vector.broadcast %cst_40 : f32 to vector<70x16xf32>
    %37 = arith.maximumf %35, %36 : vector<70x16xf32>
    %38 = arith.truncf %37 : vector<70x16xf32> to vector<70x16xbf16>
    %c0_41 = arith.constant 0 : index
    %c0_42 = arith.constant 0 : index
    %39 = vector.load %arg12[%c0_41, %c0_42] : memref<70x16xbf16, #tpu.memory_space<vmem>>, vector<70x16xbf16>
    tpu.vector_store %arg12[%c0_41, %c0_42], %38 {strides = array<i32>} : memref<70x16xbf16, #tpu.memory_space<vmem>>, vector<70x16xbf16>,
    %c0_43 = arith.constant 0 : index
    %c0_44 = arith.constant 0 : index
    %40 = vector.load %arg12[%c0_43, %c0_44] : memref<70x16xbf16, #tpu.memory_space<vmem>>, vector<2x16xbf16>
    %c0_45 = arith.constant 0 : index
    %c0_46 = arith.constant 0 : index
    %41 = vector.load %arg13[%c0_45, %c0_46] : memref<2x400xbf16, #tpu.memory_space<vmem>>, vector<2x16xbf16>
    tpu.vector_store %arg13[%c0_45, %c0_46], %40 {strides = array<i32>} : memref<2x400xbf16, #tpu.memory_space<vmem>>, vector<2x16xbf16>,
    %c2_47 = arith.constant 2 : index
    %c0_48 = arith.constant 0 : index
    %42 = vector.load %arg12[%c2_47, %c0_48] : memref<70x16xbf16, #tpu.memory_space<vmem>>, vector<2x16xbf16>
    %c0_49 = arith.constant 0 : index
    %c16_50 = arith.constant 16 : index
    %43 = vector.load %arg13[%c0_49, %c16_50] : memref<2x400xbf16, #tpu.memory_space<vmem>>, vector<2x16xbf16>
    tpu.vector_store %arg13[%c0_49, %c16_50], %42 {strides = array<i32>} : memref<2x400xbf16, #tpu.memory_space<vmem>>, vector<2x16xbf16>,
    %c4_51 = arith.constant 4 : index
    %c0_52 = arith.constant 0 : index
    %44 = vector.load %arg12[%c4_51, %c0_52] : memref<70x16xbf16, #tpu.memory_space<vmem>>, vector<2x16xbf16>
    %c0_53 = arith.constant 0 : index
    %c32_54 = arith.constant 32 : index
    %45 = vector.load %arg13[%c0_53, %c32_54] : memref<2x400xbf16, #tpu.memory_space<vmem>>, vector<2x16xbf16>
    tpu.vector_store %arg13[%c0_53, %c32_54], %44 {strides = array<i32>} : memref<2x400xbf16, #tpu.memory_space<vmem>>, vector<2x16xbf16>,
    %c6 = arith.constant 6 : index
    %c0_55 = arith.constant 0 : index
    %46 = vector.load %arg12[%c6, %c0_55] : memref<70x16xbf16, #tpu.memory_space<vmem>>, vector<2x16xbf16>
    %c0_56 = arith.constant 0 : index
    %c48_57 = arith.constant 48 : index
    %47 = vector.load %arg13[%c0_56, %c48_57] : memref<2x400xbf16, #tpu.memory_space<vmem>>, vector<2x16xbf16>
    tpu.vector_store %arg13[%c0_56, %c48_57], %46 {strides = array<i32>} : memref<2x400xbf16, #tpu.memory_space<vmem>>, vector<2x16xbf16>,
    %c8_58 = arith.constant 8 : index
    %c0_59 = arith.constant 0 : index
    %48 = vector.load %arg12[%c8_58, %c0_59] : memref<70x16xbf16, #tpu.memory_space<vmem>>, vector<2x16xbf16>
    %c0_60 = arith.constant 0 : index
    %c64_61 = arith.constant 64 : index
    %49 = vector.load %arg13[%c0_60, %c64_61] : memref<2x400xbf16, #tpu.memory_space<vmem>>, vector<2x16xbf16>
    tpu.vector_store %arg13[%c0_60, %c64_61], %48 {strides = array<i32>} : memref<2x400xbf16, #tpu.memory_space<vmem>>, vector<2x16xbf16>,
    %c14_62 = arith.constant 14 : index
    %c0_63 = arith.constant 0 : index
    %50 = vector.load %arg12[%c14_62, %c0_63] : memref<70x16xbf16, #tpu.memory_space<vmem>>, vector<2x16xbf16>
    %c0_64 = arith.constant 0 : index
    %c80 = arith.constant 80 : index
    %51 = vector.load %arg13[%c0_64, %c80] : memref<2x400xbf16, #tpu.memory_space<vmem>>, vector<2x16xbf16>
    tpu.vector_store %arg13[%c0_64, %c80], %50 {strides = array<i32>} : memref<2x400xbf16, #tpu.memory_space<vmem>>, vector<2x16xbf16>,
    %c16_65 = arith.constant 16 : index
    %c0_66 = arith.constant 0 : index
    %52 = vector.load %arg12[%c16_65, %c0_66] : memref<70x16xbf16, #tpu.memory_space<vmem>>, vector<2x16xbf16>
    %c0_67 = arith.constant 0 : index
    %c96 = arith.constant 96 : index
    %53 = vector.load %arg13[%c0_67, %c96] : memref<2x400xbf16, #tpu.memory_space<vmem>>, vector<2x16xbf16>
    tpu.vector_store %arg13[%c0_67, %c96], %52 {strides = array<i32>} : memref<2x400xbf16, #tpu.memory_space<vmem>>, vector<2x16xbf16>,
    %c18_68 = arith.constant 18 : index
    %c0_69 = arith.constant 0 : index
    %54 = vector.load %arg12[%c18_68, %c0_69] : memref<70x16xbf16, #tpu.memory_space<vmem>>, vector<2x16xbf16>
    %c0_70 = arith.constant 0 : index
    %c112 = arith.constant 112 : index
    %55 = vector.load %arg13[%c0_70, %c112] : memref<2x400xbf16, #tpu.memory_space<vmem>>, vector<2x16xbf16>
    tpu.vector_store %arg13[%c0_70, %c112], %54 {strides = array<i32>} : memref<2x400xbf16, #tpu.memory_space<vmem>>, vector<2x16xbf16>,
    %c20 = arith.constant 20 : index
    %c0_71 = arith.constant 0 : index
    %56 = vector.load %arg12[%c20, %c0_71] : memref<70x16xbf16, #tpu.memory_space<vmem>>, vector<2x16xbf16>
    %c0_72 = arith.constant 0 : index
    %c128 = arith.constant 128 : index
    %57 = vector.load %arg13[%c0_72, %c128] : memref<2x400xbf16, #tpu.memory_space<vmem>>, vector<2x16xbf16>
    tpu.vector_store %arg13[%c0_72, %c128], %56 {strides = array<i32>} : memref<2x400xbf16, #tpu.memory_space<vmem>>, vector<2x16xbf16>,
    %c22 = arith.constant 22 : index
    %c0_73 = arith.constant 0 : index
    %58 = vector.load %arg12[%c22, %c0_73] : memref<70x16xbf16, #tpu.memory_space<vmem>>, vector<2x16xbf16>
    %c0_74 = arith.constant 0 : index
    %c144 = arith.constant 144 : index
    %59 = vector.load %arg13[%c0_74, %c144] : memref<2x400xbf16, #tpu.memory_space<vmem>>, vector<2x16xbf16>
    tpu.vector_store %arg13[%c0_74, %c144], %58 {strides = array<i32>} : memref<2x400xbf16, #tpu.memory_space<vmem>>, vector<2x16xbf16>,
    %c28_75 = arith.constant 28 : index
    %c0_76 = arith.constant 0 : index
    %60 = vector.load %arg12[%c28_75, %c0_76] : memref<70x16xbf16, #tpu.memory_space<vmem>>, vector<2x16xbf16>
    %c0_77 = arith.constant 0 : index
    %c160 = arith.constant 160 : index
    %61 = vector.load %arg13[%c0_77, %c160] : memref<2x400xbf16, #tpu.memory_space<vmem>>, vector<2x16xbf16>
    tpu.vector_store %arg13[%c0_77, %c160], %60 {strides = array<i32>} : memref<2x400xbf16, #tpu.memory_space<vmem>>, vector<2x16xbf16>,
    %c30_78 = arith.constant 30 : index
    %c0_79 = arith.constant 0 : index
    %62 = vector.load %arg12[%c30_78, %c0_79] : memref<70x16xbf16, #tpu.memory_space<vmem>>, vector<2x16xbf16>
    %c0_80 = arith.constant 0 : index
    %c176 = arith.constant 176 : index
    %63 = vector.load %arg13[%c0_80, %c176] : memref<2x400xbf16, #tpu.memory_space<vmem>>, vector<2x16xbf16>
    tpu.vector_store %arg13[%c0_80, %c176], %62 {strides = array<i32>} : memref<2x400xbf16, #tpu.memory_space<vmem>>, vector<2x16xbf16>,
    %c32_81 = arith.constant 32 : index
    %c0_82 = arith.constant 0 : index
    %64 = vector.load %arg12[%c32_81, %c0_82] : memref<70x16xbf16, #tpu.memory_space<vmem>>, vector<2x16xbf16>
    %c0_83 = arith.constant 0 : index
    %c192 = arith.constant 192 : index
    %65 = vector.load %arg13[%c0_83, %c192] : memref<2x400xbf16, #tpu.memory_space<vmem>>, vector<2x16xbf16>
    tpu.vector_store %arg13[%c0_83, %c192], %64 {strides = array<i32>} : memref<2x400xbf16, #tpu.memory_space<vmem>>, vector<2x16xbf16>,
    %c34 = arith.constant 34 : index
    %c0_84 = arith.constant 0 : index
    %66 = vector.load %arg12[%c34, %c0_84] : memref<70x16xbf16, #tpu.memory_space<vmem>>, vector<2x16xbf16>
    %c0_85 = arith.constant 0 : index
    %c208 = arith.constant 208 : index
    %67 = vector.load %arg13[%c0_85, %c208] : memref<2x400xbf16, #tpu.memory_space<vmem>>, vector<2x16xbf16>
    tpu.vector_store %arg13[%c0_85, %c208], %66 {strides = array<i32>} : memref<2x400xbf16, #tpu.memory_space<vmem>>, vector<2x16xbf16>,
    %c36 = arith.constant 36 : index
    %c0_86 = arith.constant 0 : index
    %68 = vector.load %arg12[%c36, %c0_86] : memref<70x16xbf16, #tpu.memory_space<vmem>>, vector<2x16xbf16>
    %c0_87 = arith.constant 0 : index
    %c224 = arith.constant 224 : index
    %69 = vector.load %arg13[%c0_87, %c224] : memref<2x400xbf16, #tpu.memory_space<vmem>>, vector<2x16xbf16>
    tpu.vector_store %arg13[%c0_87, %c224], %68 {strides = array<i32>} : memref<2x400xbf16, #tpu.memory_space<vmem>>, vector<2x16xbf16>,
    %c42 = arith.constant 42 : index
    %c0_88 = arith.constant 0 : index
    %70 = vector.load %arg12[%c42, %c0_88] : memref<70x16xbf16, #tpu.memory_space<vmem>>, vector<2x16xbf16>
    %c0_89 = arith.constant 0 : index
    %c240 = arith.constant 240 : index
    %71 = vector.load %arg13[%c0_89, %c240] : memref<2x400xbf16, #tpu.memory_space<vmem>>, vector<2x16xbf16>
    tpu.vector_store %arg13[%c0_89, %c240], %70 {strides = array<i32>} : memref<2x400xbf16, #tpu.memory_space<vmem>>, vector<2x16xbf16>,
    %c44 = arith.constant 44 : index
    %c0_90 = arith.constant 0 : index
    %72 = vector.load %arg12[%c44, %c0_90] : memref<70x16xbf16, #tpu.memory_space<vmem>>, vector<2x16xbf16>
    %c0_91 = arith.constant 0 : index
    %c256 = arith.constant 256 : index
    %73 = vector.load %arg13[%c0_91, %c256] : memref<2x400xbf16, #tpu.memory_space<vmem>>, vector<2x16xbf16>
    tpu.vector_store %arg13[%c0_91, %c256], %72 {strides = array<i32>} : memref<2x400xbf16, #tpu.memory_space<vmem>>, vector<2x16xbf16>,
    %c46 = arith.constant 46 : index
    %c0_92 = arith.constant 0 : index
    %74 = vector.load %arg12[%c46, %c0_92] : memref<70x16xbf16, #tpu.memory_space<vmem>>, vector<2x16xbf16>
    %c0_93 = arith.constant 0 : index
    %c272 = arith.constant 272 : index
    %75 = vector.load %arg13[%c0_93, %c272] : memref<2x400xbf16, #tpu.memory_space<vmem>>, vector<2x16xbf16>
    tpu.vector_store %arg13[%c0_93, %c272], %74 {strides = array<i32>} : memref<2x400xbf16, #tpu.memory_space<vmem>>, vector<2x16xbf16>,
    %c48_94 = arith.constant 48 : index
    %c0_95 = arith.constant 0 : index
    %76 = vector.load %arg12[%c48_94, %c0_95] : memref<70x16xbf16, #tpu.memory_space<vmem>>, vector<2x16xbf16>
    %c0_96 = arith.constant 0 : index
    %c288 = arith.constant 288 : index
    %77 = vector.load %arg13[%c0_96, %c288] : memref<2x400xbf16, #tpu.memory_space<vmem>>, vector<2x16xbf16>
    tpu.vector_store %arg13[%c0_96, %c288], %76 {strides = array<i32>} : memref<2x400xbf16, #tpu.memory_space<vmem>>, vector<2x16xbf16>,
    %c50 = arith.constant 50 : index
    %c0_97 = arith.constant 0 : index
    %78 = vector.load %arg12[%c50, %c0_97] : memref<70x16xbf16, #tpu.memory_space<vmem>>, vector<2x16xbf16>
    %c0_98 = arith.constant 0 : index
    %c304 = arith.constant 304 : index
    %79 = vector.load %arg13[%c0_98, %c304] : memref<2x400xbf16, #tpu.memory_space<vmem>>, vector<2x16xbf16>
    tpu.vector_store %arg13[%c0_98, %c304], %78 {strides = array<i32>} : memref<2x400xbf16, #tpu.memory_space<vmem>>, vector<2x16xbf16>,
    %c56_99 = arith.constant 56 : index
    %c0_100 = arith.constant 0 : index
    %80 = vector.load %arg12[%c56_99, %c0_100] : memref<70x16xbf16, #tpu.memory_space<vmem>>, vector<2x16xbf16>
    %c0_101 = arith.constant 0 : index
    %c320 = arith.constant 320 : index
    %81 = vector.load %arg13[%c0_101, %c320] : memref<2x400xbf16, #tpu.memory_space<vmem>>, vector<2x16xbf16>
    tpu.vector_store %arg13[%c0_101, %c320], %80 {strides = array<i32>} : memref<2x400xbf16, #tpu.memory_space<vmem>>, vector<2x16xbf16>,
    %c58 = arith.constant 58 : index
    %c0_102 = arith.constant 0 : index
    %82 = vector.load %arg12[%c58, %c0_102] : memref<70x16xbf16, #tpu.memory_space<vmem>>, vector<2x16xbf16>
    %c0_103 = arith.constant 0 : index
    %c336 = arith.constant 336 : index
    %83 = vector.load %arg13[%c0_103, %c336] : memref<2x400xbf16, #tpu.memory_space<vmem>>, vector<2x16xbf16>
    tpu.vector_store %arg13[%c0_103, %c336], %82 {strides = array<i32>} : memref<2x400xbf16, #tpu.memory_space<vmem>>, vector<2x16xbf16>,
    %c60 = arith.constant 60 : index
    %c0_104 = arith.constant 0 : index
    %84 = vector.load %arg12[%c60, %c0_104] : memref<70x16xbf16, #tpu.memory_space<vmem>>, vector<2x16xbf16>
    %c0_105 = arith.constant 0 : index
    %c352 = arith.constant 352 : index
    %85 = vector.load %arg13[%c0_105, %c352] : memref<2x400xbf16, #tpu.memory_space<vmem>>, vector<2x16xbf16>
    tpu.vector_store %arg13[%c0_105, %c352], %84 {strides = array<i32>} : memref<2x400xbf16, #tpu.memory_space<vmem>>, vector<2x16xbf16>,
    %c62 = arith.constant 62 : index
    %c0_106 = arith.constant 0 : index
    %86 = vector.load %arg12[%c62, %c0_106] : memref<70x16xbf16, #tpu.memory_space<vmem>>, vector<2x16xbf16>
    %c0_107 = arith.constant 0 : index
    %c368 = arith.constant 368 : index
    %87 = vector.load %arg13[%c0_107, %c368] : memref<2x400xbf16, #tpu.memory_space<vmem>>, vector<2x16xbf16>
    tpu.vector_store %arg13[%c0_107, %c368], %86 {strides = array<i32>} : memref<2x400xbf16, #tpu.memory_space<vmem>>, vector<2x16xbf16>,
    %c64_108 = arith.constant 64 : index
    %c0_109 = arith.constant 0 : index
    %88 = vector.load %arg12[%c64_108, %c0_109] : memref<70x16xbf16, #tpu.memory_space<vmem>>, vector<2x16xbf16>
    %c0_110 = arith.constant 0 : index
    %c384 = arith.constant 384 : index
    %89 = vector.load %arg13[%c0_110, %c384] : memref<2x400xbf16, #tpu.memory_space<vmem>>, vector<2x16xbf16>
    tpu.vector_store %arg13[%c0_110, %c384], %88 {strides = array<i32>} : memref<2x400xbf16, #tpu.memory_space<vmem>>, vector<2x16xbf16>,
    %c0_111 = arith.constant 0 : index
    %c0_112 = arith.constant 0 : index
    %90 = vector.load %arg13[%c0_111, %c0_112] : memref<2x400xbf16, #tpu.memory_space<vmem>>, vector<2x400xbf16>
    %c0_113 = arith.constant 0 : index
    %c0_114 = arith.constant 0 : index
    %91 = vector.load %arg5[%c0_113, %c0_114] : memref<400x32xbf16, #tpu.memory_space<vmem>>, vector<400x32xbf16>
    %cst_115 = arith.constant dense<0.000000e+00> : vector<2x32xf32>
    %92 = tpu.matmul %90, %91, %cst_115 {dimension_numbers = #tpu.dot_dimension_numbers<[1], [0], [0], [1], [0, 0, 1, 1], [], []>} : vector<2x400xbf16>, vector<400x32xbf16>, vector<2x32xf32> -> vector<2x32xf32>
    %c0_116 = arith.constant 0 : index
    %c0_117 = arith.constant 0 : index
    %93 = vector.load %arg6[%c0_116, %c0_117] : memref<1x32xf32, #tpu.memory_space<vmem>>, vector<1x32xf32>
    %94 = vector.broadcast %93 : vector<1x32xf32> to vector<2x32xf32>
    %95 = arith.addf %92, %94 : vector<2x32xf32>
    %cst_118 = arith.constant 0.000000e+00 : f32
    %96 = vector.broadcast %cst_118 : f32 to vector<2x32xf32>
    %97 = arith.maximumf %95, %96 : vector<2x32xf32>
    %98 = arith.truncf %97 : vector<2x32xf32> to vector<2x32xbf16>
    %c0_119 = arith.constant 0 : index
    %c0_120 = arith.constant 0 : index
    %99 = vector.load %arg7[%c0_119, %c0_120] : memref<32x18xbf16, #tpu.memory_space<vmem>>, vector<32x18xbf16>
    %cst_121 = arith.constant dense<0.000000e+00> : vector<2x18xf32>
    %100 = tpu.matmul %98, %99, %cst_121 {dimension_numbers = #tpu.dot_dimension_numbers<[1], [0], [0], [1], [0, 0, 1, 1], [], []>} : vector<2x32xbf16>, vector<32x18xbf16>, vector<2x18xf32> -> vector<2x18xf32>
    %c0_122 = arith.constant 0 : index
    %c0_123 = arith.constant 0 : index
    %101 = vector.load %arg8[%c0_122, %c0_123] : memref<1x18xf32, #tpu.memory_space<vmem>>, vector<1x18xf32>
    %102 = vector.broadcast %101 : vector<1x18xf32> to vector<2x18xf32>
    %103 = arith.addf %100, %102 : vector<2x18xf32>
    %c0_124 = arith.constant 0 : index
    %c0_125 = arith.constant 0 : index
    %104 = vector.load %arg9[%c0_124, %c0_125] : memref<2x18xf32, #tpu.memory_space<vmem>>, vector<2x18xf32>
    tpu.vector_store %arg9[%c0_124, %c0_125], %103 {strides = array<i32>} : memref<2x18xf32, #tpu.memory_space<vmem>>, vector<2x18xf32>,
    return
  }
}

</mosaic_0001>

<bundles_post_ra>
// kernel: deep_q_network_forward.1
= control target key start
LH: loop header
LB: loop body
LE: loop exit
PB: predicated region body
PF: predicated region fallthrough
CT: control target
= control target key end

     0   :  { %v2440_v1 = vmov 0.0   ;;  %vm2441_vm0 = vmmov 0   ;;  %vm119_vm1 = vcmask 523264   ;;  %s3224_s0 = inlined_call_operand.vmem [shape: bf16[98,64], index: 0, kind: input, shape index: {}]   ;;  %s3225_s1 = inlined_call_operand.vmem [shape: bf16[64,8], index: 1, kind: input, shape index: {}]   ;;  %s3226_s2 = inlined_call_operand.vmem [shape: f32[1,8], index: 2, kind: input, shape index: {}]   ;;  %s3227_s3 = inlined_call_operand.vmem [shape: bf16[72,16], index: 3, kind: input, shape index: {}]   ;;  %s3228_s4 = inlined_call_operand.vmem [shape: f32[1,16], index: 4, kind: input, shape index: {}]   ;;  %s3229_s5 = inlined_call_operand.vmem [shape: bf16[400,32], index: 5, kind: input, shape index: {}]   ;;  %s3230_s6 = inlined_call_operand.vmem [shape: f32[1,32], index: 6, kind: input, shape index: {}]   ;;  %s3231_s7 = inlined_call_operand.vmem [shape: bf16[32,18], index: 7, kind: input, shape index: {}]   ;;  %s3232_s8 = inlined_call_operand.vmem [shape: f32[1,18], index: 8, kind: input, shape index: {}]   ;;  %s3233_s9 = inlined_call_operand.hbm [shape: f32[2,18], index: 9, kind: output, shape index: {}]  }
   0x1   :  { %v2368_v0 = vld [vmem:[%s3225_s1] sm:$0xff]   ;;  %2278 = vmatprep.subr.bf16.mxu0 %v2440_v1  ;;  %2314 = vmatprep.subr.bf16.mxu1 %v2440_v1  ;;  %v2369_v2 = vld [vmem:[%s3225_s1 + $0x8] sm:$0xff]   ;;  %v2370_v3 = vld [vmem:[%s3225_s1 + $0x10] sm:$0xff]  }
   0x2   :  { %2279 = vmatpush3.bf16.msra.mxu0 %v2368_v0  ;;  %2286 = vmatprep.mubr.msk.bf16.mxu0 %vm2441_vm0, %v2440_v1  ;;  %v2371_v4 = vld [vmem:[%s3225_s1 + $0x18] sm:$0xff]   ;;  %v2372_v5 = vld [vmem:[%s3224_s0] sm:$0xff]   ;;  %v2373_v6 = vld [vmem:[%s3224_s0 + $0x8] sm:$0xff]  }
   0x3   :  { %2280 = vmatprep.subr.bf16.mxu0 %v2440_v1  ;;  %2324 = vmatprep.mubr.msk.bf16.mxu1 %vm2441_vm0, %v2440_v1  ;;  %v2374_v7 = vld [vmem:[%s3224_s0 + $0x10] sm:$0xff]  }
   0x6   :  { %2281 = vmatpush3.bf16.msra.mxu0 %v2369_v2 }
   0x7   :  { %2282 = vmatprep.subr.bf16.mxu0 %v2440_v1 }
   0xa   :  { %2283 = vmatpush3.bf16.msra.mxu0 %v2370_v3 }
   0xb   :  { %2284 = vmatprep.subr.bf16.mxu0 %v2440_v1 }
   0xe   :  { %2285 = vmatpush3.bf16.msra.mxu0 %v2371_v4 }
  0x11   :  { %2287 = vmatmul.mubr.msk.bf16.vlgmr.msra.gmra.mrb[0].mxu0 %vm119_vm1, %v2372_v5 }
  0x12   :  { %2290 = vmatprep.mubr.msk.bf16.mxu0 %vm2441_vm0, %v2440_v1 }
  0x19   :  { %2291 = vmatmul.mubr.msk.bf16.gmra.mrb[4].mxu0 %vm119_vm1, %v2373_v6 }
  0x1a   :  { %2294 = vmatprep.mubr.msk.bf16.mxu0 %vm2441_vm0, %v2440_v1 }
  0x1b   :  { %14 = vsyncpa [#allocation7], 0  ;;  %v2375_v8 = vld [vmem:[%s3224_s0 + $0x18] sm:$0xff]   ;;  %v2376_v9 = vld [vmem:[%s3224_s0 + $0x20] sm:$0xff]   ;;  %vm242_vm2 = vcmask 60416   ;;  %v2442_v12 = vmov 0  }
  0x1c   :  { %v2377_v10 = vld [vmem:[%s3224_s0 + $0x28] sm:$0xff]   ;;  %v2378_v11 = vld [vmem:[%s3224_s0 + $0x30] ss:$0 sps:$4 sm:$0x11]   ;;  %243 = vst.msk [vmem:[#allocation2] sm:$0xf] %vm242_vm2, %v2442_v12  ;;  %1967 = vmatprep.subr.bf16.mxu0 %v2442_v12 }
  0x1d   :  { %244 = vst.msk [vmem:[#allocation2 + $0x4] sm:$0xf] %vm242_vm2, %v2442_v12  ;;  %245 = vst.msk [vmem:[#allocation2 + $0x8] sm:$0xf] %vm242_vm2, %v2442_v12  ;;  %vm255_vm3 = vcmask 59392   ;;  %vm447_vm4 = vcmask 1041408  }
  0x1e   :  { %246 = vst.msk [vmem:[#allocation2 + $0xc] sm:$0xf] %vm242_vm2, %v2442_v12  ;;  %247 = vst.msk [vmem:[#allocation2 + $0x10] sm:$0xf] %vm242_vm2, %v2442_v12  ;;  %v2597_v13 = vld [vmem:[%s3226_s2] ss:$0 sm:$0xff] }
  0x1f   :  { %248 = vst.msk [vmem:[#allocation2 + $0x14] sm:$0xf] %vm242_vm2, %v2442_v12  ;;  %249 = vst.msk [vmem:[#allocation2 + $0x18] sm:$0xf] %vm242_vm2, %v2442_v12  ;;  %vm448_vm5 = vcmask 1045508   ;;  %vm360_vm6 = vcmask 1042432  }
  0x20   :  { %250 = vst.msk [vmem:[#allocation2 + $0x1c] sm:$0xf] %vm242_vm2, %v2442_v12  ;;  %251 = vst.msk [vmem:[#allocation2 + $0x20] sm:$0xf] %vm242_vm2, %v2442_v12  ;;  %vm361_vm7 = vcmask 1046532   ;;  %s2443_s2 = smov 16  }
  0x21   :  { %2295 = vmatmul.mubr.msk.bf16.gmra.mrb[8].mxu0 %vm119_vm1, %v2374_v7  ;;  %252 = vst.msk [vmem:[#allocation2 + $0x24] sm:$0xf] %vm242_vm2, %v2442_v12  ;;  %253 = vst.msk [vmem:[#allocation2 + $0x28] sm:$0xf] %vm242_vm2, %v2442_v12  ;;  %s2444_s10 = smov 8   ;;  %s2445_s11 = smov 32  }
  0x22   :  { %2298 = vmatprep.mubr.msk.bf16.mxu0 %vm2441_vm0, %v2440_v1  ;;  %254 = vst.msk [vmem:[#allocation2 + $0x2c] sm:$0xf] %vm242_vm2, %v2442_v12  ;;  %vm2606_vm8 = vmor %vm447_vm4, %vm448_vm5  ;;  %vm536_vm10 = vcmask 1040384   ;;  %vm537_vm11 = vcmask 1044484   ;;  %s2446_s12 = smov 24   ;;  %s2447_s13 = smov 40  }
  0x23   :  { %256 = vst.msk [vmem:[#allocation2 + $0x30] sm:$0x7] %vm255_vm3, %v2442_v12  ;;  %vm2611_vm9 = vmor %vm360_vm6, %vm361_vm7  ;;  %s2448_s14 = smov 64   ;;  %s2449_s22 = smov 48   ;;  %vm322_vm13 = vcmask 57344   ;;  %vm1062_vm14 = vcmask 1043456  }
  0x24   :  { %vm2640_vm12 = vmor %vm536_vm10, %vm537_vm11  ;;  %s2450_s23 = smov 56   ;;  %vm416_vm15 = vcmask 126016   ;;  %vm732_vm4 = vcmask 388416   ;;  %vm818_vm5 = vcmask 454016   ;;  %vm904_vm6 = vcmask 519616   ;;  %s2453_s29 = smov 96  }
  0x25   :  { %vm960_vm7 = vcmask 585216   ;;  %vm514_vm10 = vcmask 190592   ;;  %vm603_vm11 = vcmask 256192   ;;  %s2454_s0 = smov 112   ;;  %s2455_s20 = smov [#allocation6]  }
  0x26   :  { %s2084_s1 = sshll.u32 %s2455_s20, 4  ;;  %s2085_s1 = int_to_ptr.vmem [resolvable:$true] %s2084_s1 }
  0x27   :  { %p2421_p1 = scmp.lt.s32.totalorder %s2085_s1, %s2085_s1 }
  0x29   :  { %2299 = vmatmul.mubr.msk.bf16.gmra.mrb[12].mxu0 %vm119_vm1, %v2375_v8 }
  0x2a   :  { %2302 = vmatprep.mubr.msk.bf16.mxu0 %vm2441_vm0, %v2440_v1 }
  0x31   :  { %2303 = vmatmul.mubr.msk.bf16.gmra.mrb[16].mxu0 %vm119_vm1, %v2376_v9 }
  0x32   :  { %2306 = vmatprep.mubr.msk.bf16.mxu0 %vm2441_vm0, %v2440_v1 }
  0x39   :  { %2307 = vmatmul.mubr.msk.bf16.gmra.mrb[20].mxu0 %vm119_vm1, %v2377_v10 }
  0x3a   :  { %2310 = vmatprep.mubr.msk.bf16.mxu0 %vm2441_vm0, %v2440_v1 }
  0x41   :  { %2311 = vmatmul.mubr.msk.bf16.gmra.mrb[24].mxu0 %vm119_vm1, %v2378_v11  ;;  %vm505_vm1 = vcmask 191616  }
  0xe4   :  { %v175_v14 = vpop.f32.mrb[0].mxu0 }
  0xe5   :  { %v176_v15 = vadd.f32 %v2597_v13, %v175_v14  ;;  %v2288_v16 = vpop.f32.mrb[1].mxu0 }
  0xe6   :  { %v178_v17 = vpop.f32.mrb[2].mxu0 }
  0xe7   :  { %v229_v18 = vmax.f32 %v176_v15, 0.0  ;;  %v179_v19 = vadd.f32 %v2597_v13, %v178_v17  ;;  %v2289_v20 = vpop.f32.mrb[3].mxu0 }
  0xe9   :  { %v2210_v21 = vpack.c.bf16 %v229_v18, %v229_v18  ;;  %v230_v22 = vmax.f32 %v179_v19, 0.0 }
  0xeb   :  { %310 = vst.msk [vmem:[#allocation2] sm:$0xf] %vm242_vm2, %v2210_v21  ;;  %v2211_v23 = vpack.c.bf16 %v230_v22, %v230_v22 }
  0xec   :  { %v183_v24 = vpop.f32.mrb[4].mxu0 }
  0xed   :  { %311 = vst.msk [vmem:[#allocation2 + $0x4] sm:$0xf] %vm242_vm2, %v2211_v23  ;;  %v184_v25 = vadd.f32 %v2597_v13, %v183_v24  ;;  %v2292_v26 = vpop.f32.mrb[5].mxu0 }
  0xee   :  { %v186_v27 = vpop.f32.mrb[6].mxu0 }
  0xef   :  { %v231_v28 = vmax.f32 %v184_v25, 0.0  ;;  %v187_v29 = vadd.f32 %v2597_v13, %v186_v27  ;;  %v2293_v30 = vpop.f32.mrb[7].mxu0 }
  0xf1   :  { %v2212_v31 = vpack.c.bf16 %v231_v28, %v231_v28  ;;  %v232_v32 = vmax.f32 %v187_v29, 0.0 }
  0xf2   :  { %v427_v33 = vld [vmem:[#allocation2] sm:$0xc] }
  0xf3   :  { %v342_v34 = vld [vmem:[#allocation2] sm:$0xe]  ;;  %312 = vst.msk [vmem:[#allocation2 + $0x8] sm:$0xf] %vm242_vm2, %v2212_v31  ;;  %v2213_v36 = vpack.c.bf16 %v232_v32, %v232_v32  ;;  %v2125_v40 = vrot.slane %v427_v33, 10 }
  0xf4   :  { %v324_v35 = vld [vmem:[#allocation2] sm:$0xf]  ;;  %v191_v38 = vpop.f32.mrb[8].mxu0  ;;  %v428_v39 = vld [vmem:[#allocation2 + $0x4] sm:$0xf]  ;;  %v2124_v46 = vrot.slane %v342_v34, 9 }
  0xf5   :  { %333 = vst.msk [vmem:[#allocation3] sm:$0xf] %vm242_vm2, %v324_v35  ;;  %v343_v41 = vld [vmem:[#allocation2 + $0x4] sm:$0xf]  ;;  %313 = vst.msk [vmem:[#allocation2 + $0xc] sm:$0xf] %vm242_vm2, %v2213_v36  ;;  %v192_v43 = vadd.f32 %v2597_v13, %v191_v38 }
  0xf6   :  { %v2296_v44 = vpop.f32.mrb[9].mxu0  ;;  %v452_v45 = vrot.slane %v428_v39, 6  ;;  %v365_v47 = vrot.slane %v343_v41, 5  ;;  %v325_v49 = vld [vmem:[#allocation2 + $0x4] sm:$0xf] }
  0xf7   :  { %v194_v48 = vpop.f32.mrb[10].mxu0  ;;  %v233_v50 = vmax.f32 %v192_v43, 0.0  ;;  %334 = vst.msk [vmem:[#allocation3 + $0x4] sm:$0xf] %vm242_vm2, %v325_v49  ;;  %v516_v9 = vld [vmem:[#allocation2 + $0x4] sm:$0x8] }
  0xf8   :  { %v195_v51 = vadd.f32 %v2597_v13, %v194_v48  ;;  %v453_v52 = vsel %vm2606_vm8, %v2125_v40, %v452_v45  ;;  %v366_v53 = vsel %vm2611_vm9, %v2124_v46, %v365_v47  ;;  %v2297_v54 = vpop.f32.mrb[11].mxu0  ;;  %v367_v5 = vrot.slane %v365_v47, 4 }
  0xf9   :  { %478 = vrot.lane.b32.xlu1 %v453_v52, %s2443_s2  ;;  %389 = vrot.lane.b32.xlu0 %v366_v53, %s2444_s10  ;;  %v2214_v55 = vpack.c.bf16 %v233_v50, %v233_v50  ;;  %v454_v8 = vrot.slane %v452_v45, 4  ;;  %v2126_v22 = vrot.slane %v516_v9, 11 }
  0xfa   :  { %v234_v56 = vmax.f32 %v195_v51, 0.0  ;;  %v605_v57 = vld [vmem:[#allocation2 + $0x8] sm:$0xf] }
  0xfb   :  { %v344_v58 = vld [vmem:[#allocation2 + $0x8] sm:$0xf]  ;;  %314 = vst.msk [vmem:[#allocation2 + $0x10] sm:$0xf] %vm242_vm2, %v2214_v55 }
  0xfc   :  { %v2625_v59 = vld [vmem:[#allocation2 + $0x8] sm:$0xf]  ;;  %v2215_v60 = vpack.c.bf16 %v234_v56, %v234_v56  ;;  %v368_v61 = vrot.slane %v344_v58, 5  ;;  %v199_v63 = vpop.f32.mrb[12].mxu0  ;;  %v606_v0 = vld [vmem:[#allocation2 + $0xc] sm:$0xf] }
  0xfd   :  { %v517_v62 = vld [vmem:[#allocation2 + $0x8] sm:$0xf]  ;;  %623 = vrot.lane.b32.xlu0 %v605_v57, %s2445_s11  ;;  %v455_v2 = vrot.slane %v2625_v59, 6  ;;  %v200_v4 = vadd.f32 %v2597_v13, %v199_v63  ;;  %625 = vrot.lane.b32.xlu1 %v606_v0, %s2445_s11  ;;  %v2633_v6 = vld [vmem:[#allocation2 + $0xc] sm:$0xf]  ;;  %v2300_v7 = vpop.f32.mrb[13].mxu0 }
  0xfe   :  { %v541_v3 = vrot.slane %v517_v62, 7  ;;  %315 = vst.msk [vmem:[#allocation2 + $0x14] sm:$0xf] %vm242_vm2, %v2215_v60  ;;  %v202_v10 = vpop.f32.mrb[14].mxu0  ;;  %v369_v14 = vsel %vm2611_vm9, %v367_v5, %v368_v61  ;;  %v544_v19 = vrot.slane %v2633_v6, 7  ;;  %v370_v39 = vrot.slane %v368_v61, 4 }
  0xff   :  { %v235_v11 = vmax.f32 %v200_v4, 0.0  ;;  %v2301_v15 = vpop.f32.mrb[15].mxu0  ;;  %v456_v16 = vsel %vm2606_vm8, %v454_v8, %v455_v2  ;;  %v662_v20 = vld [vmem:[#allocation2 + $0xc] sm:$0xf]  ;;  %v203_v23 = vadd.f32 %v2597_v13, %v202_v10  ;;  %v326_v24 = vld [vmem:[#allocation2 + $0x8] sm:$0xf] }
 0x100   :  { %v543_v18 = vrot.slane %v541_v3, 4  ;;  %v327_v25 = vld [vmem:[#allocation2 + $0xc] sm:$0xf]  ;;  %v661_v26 = vld [vmem:[#allocation2 + $0x8] sm:$0xe]  ;;  %v542_v27 = vsel %vm2640_vm12, %v2126_v22, %v541_v3  ;;  %v681_v28 = vrot.slane %v662_v20, 5 }
 0x101   :  { %391 = vrot.lane.b32.xlu0 %v369_v14, %s2444_s10  ;;  %v2216_v21 = vpack.c.bf16 %v235_v11, %v235_v11  ;;  %480 = vrot.lane.b32.xlu1 %v456_v16, %s2443_s2  ;;  %335 = vst.msk [vmem:[#allocation3 + $0x8] sm:$0xf] %vm242_vm2, %v326_v24  ;;  %336 = vst.msk [vmem:[#allocation3 + $0xc] sm:$0xf] %vm242_vm2, %v327_v25  ;;  %v236_v29 = vmax.f32 %v203_v23, 0.0  ;;  %v2127_v32 = vrot.slane %v661_v26, 9 }
 0x102   :  { %v545_v30 = vsel %vm2640_vm12, %v543_v18, %v544_v19  ;;  %v345_v31 = vld [vmem:[#allocation2 + $0xc] sm:$0xf]  ;;  %v2664_v46 = vld [vmem:[#allocation2 + $0x10] sm:$0xf]  ;;  %v457_v50 = vrot.slane %v455_v2, 4  ;;  %v683_v55 = vrot.slane %v681_v28, 4 }
 0x103   :  { %316 = vst.msk [vmem:[#allocation2 + $0x18] sm:$0xf] %vm242_vm2, %v2216_v21  ;;  %v2217_v33 = vpack.c.bf16 %v236_v29, %v236_v29  ;;  %v682_v38 = vsel %vm2611_vm9, %v2127_v32, %v681_v28  ;;  %v371_v40 = vrot.slane %v345_v31, 5  ;;  %v430_v43 = vld [vmem:[#allocation2 + $0xc] sm:$0xf]  ;;  %v684_v53 = vrot.slane %v2664_v46, 5 }
 0x104   :  { %v207_v34 = vpop.f32.mrb[16].mxu0  ;;  %v458_v51 = vrot.slane %v430_v43, 6  ;;  %v2672_v54 = vld [vmem:[#allocation2 + $0x10] sm:$0xf]  ;;  %v2379_v59 = vld [vmem:[%s3227_s3] sm:$0xff]   ;;  %v2380_v20 = vld [vmem:[%s3227_s3 + $0x8] sm:$0xff]  }
 0x105   :  { %567 = vrot.lane.b32.xlu0 %v542_v27, %s2446_s12  ;;  %569 = vrot.lane.b32.xlu1 %v545_v30, %s2446_s12  ;;  %v208_v35 = vadd.f32 %v2597_v13, %v207_v34  ;;  %v2304_v36 = vpop.f32.mrb[17].mxu0  ;;  %317 = vst.msk [vmem:[#allocation2 + $0x1c] sm:$0xf] %vm242_vm2, %v2217_v33  ;;  %v916_v41 = vld [vmem:[#allocation2 + $0x14] sm:$0xf]  ;;  %v372_v49 = vsel %vm2611_vm9, %v370_v39, %v371_v40  ;;  %v374_v61 = vrot.slane %v2672_v54, 5 }
 0x106   :  { %v210_v45 = vpop.f32.mrb[18].mxu0  ;;  %v608_v52 = vld [vmem:[#allocation2 + $0x14] sm:$0xf]  ;;  %v459_v56 = vsel %vm2606_vm8, %v457_v50, %v458_v51  ;;  %v685_v60 = vsel %vm2611_vm9, %v683_v55, %v684_v53  ;;  %v2688_v63 = vld [vmem:[#allocation2 + $0x10] sm:$0xf]  ;;  %2315 = vmatpush3.bf16.msra.mxu1 %v2379_v59  ;;  %v373_v3 = vrot.slane %v371_v40, 4 }
 0x107   :  { %v237_v44 = vmax.f32 %v208_v35, 0.0  ;;  %v2305_v47 = vpop.f32.mrb[19].mxu0  ;;  %v211_v57 = vadd.f32 %v2597_v13, %v210_v45  ;;  %2316 = vmatprep.subr.bf16.mxu1 %v2440_v1  ;;  %v915_v7 = vld [vmem:[#allocation2 + $0x10] sm:$0xf]  ;;  %v461_v14 = vrot.slane %v2688_v63, 6  ;;  %v460_v21 = vrot.slane %v458_v51, 4 }
 0x108   :  { %v744_v8 = vld [vmem:[#allocation2 + $0x10] sm:$0xf]  ;;  %v375_v11 = vsel %vm2611_vm9, %v373_v3, %v374_v61  ;;  %v2698_v18 = vld [vmem:[#allocation2 + $0x14] sm:$0xf]  ;;  %v743_v22 = vld [vmem:[#allocation2 + $0xc] sm:$0xc] }
 0x109   :  { %705 = vrot.lane.b32.xlu0 %v682_v38, %s2447_s13  ;;  %935 = vrot.lane.b32.xlu1 %v916_v41, %s2448_s14  ;;  %v2218_v48 = vpack.c.bf16 %v237_v44, %v237_v44  ;;  %v238_v0 = vmax.f32 %v211_v57, 0.0  ;;  %v765_v23 = vrot.slane %v744_v8, 6  ;;  %v607_v24 = vld [vmem:[#allocation2 + $0x10] sm:$0xf]  ;;  %v462_v28 = vsel %vm2606_vm8, %v460_v21, %v461_v14  ;;  %v2716_v32 = vld [vmem:[#allocation2 + $0x14] sm:$0xf] }
 0x10a   :  { %v830_v25 = vld [vmem:[#allocation2 + $0x10] sm:$0xf]  ;;  %2317 = vmatpush3.bf16.msra.mxu1 %v2380_v20  ;;  %v768_v30 = vrot.slane %v2698_v18, 6  ;;  %v2128_v31 = vrot.slane %v743_v22, 10  ;;  %v829_v34 = vld [vmem:[#allocation2 + $0xc] sm:$0x8] }
 0x10b   :  { %318 = vst.msk [vmem:[#allocation2 + $0x20] sm:$0xf] %vm242_vm2, %v2218_v48  ;;  %v2219_v9 = vpack.c.bf16 %v238_v0, %v238_v0  ;;  %v2381_v26 = vld [vmem:[%s3227_s3 + $0x10] sm:$0xff]   ;;  %v767_v29 = vrot.slane %v765_v23, 4  ;;  %2318 = vmatprep.subr.bf16.mxu1 %v2440_v1  ;;  %v851_v35 = vrot.slane %v830_v25, 7  ;;  %v2382_v41 = vld [vmem:[%s3227_s3 + $0x18] sm:$0xff]  }
 0x10c   :  { %v215_v58 = vpop.f32.mrb[20].mxu0  ;;  %v766_v38 = vsel %vm2606_vm8, %v2128_v31, %v765_v23  ;;  %v519_v39 = vld [vmem:[#allocation2 + $0x10] sm:$0xf]  ;;  %v2129_v47 = vrot.slane %v829_v34, 11  ;;  %v2733_v48 = vld [vmem:[#allocation2 + $0x14] sm:$0xf] }
 0x10d   :  { %393 = vrot.lane.b32.xlu0 %v372_v49, %s2444_s10  ;;  %629 = vrot.lane.b32.xlu1 %v608_v52, %s2445_s11  ;;  %v216_v62 = vadd.f32 %v2597_v13, %v215_v58  ;;  %v2308_v2 = vpop.f32.mrb[21].mxu0  ;;  %319 = vst.msk [vmem:[#allocation2 + $0x24] sm:$0xf] %vm242_vm2, %v2219_v9  ;;  %v769_v43 = vsel %vm2606_vm8, %v767_v29, %v768_v30  ;;  %v853_v44 = vrot.slane %v851_v35, 4  ;;  %v547_v50 = vrot.slane %v519_v39, 7 }
 0x10e   :  { %v218_v5 = vpop.f32.mrb[22].mxu0  ;;  %2319 = vmatpush3.bf16.msra.mxu1 %v2381_v26  ;;  %v852_v52 = vsel %vm2640_vm12, %v2129_v47, %v851_v35  ;;  %v550_v57 = vrot.slane %v2733_v48, 7  ;;  %v664_v58 = vld [vmem:[#allocation2 + $0x14] sm:$0xf]  ;;  %v686_v2 = vrot.slane %v684_v53, 4  ;;  %v376_v46 = vrot.slane %v374_v61, 4 }
 0x10f   :  { %v239_v4 = vmax.f32 %v216_v62, 0.0  ;;  %v2309_v10 = vpop.f32.mrb[23].mxu0  ;;  %v219_v33 = vadd.f32 %v2597_v13, %v218_v5  ;;  %2320 = vmatprep.subr.bf16.mxu1 %v2440_v1  ;;  %v687_v3 = vrot.slane %v664_v58, 5  ;;  %v347_v5 = vld [vmem:[#allocation2 + $0x14] sm:$0xf]  ;;  %v463_v61 = vrot.slane %v461_v14, 4 }
 0x110   :  { %v329_v8 = vld [vmem:[#allocation2 + $0x14] sm:$0xf]  ;;  %v330_v6 = vld [vmem:[#allocation2 + $0x18] sm:$0xf]  ;;  %v377_v53 = vrot.slane %v347_v5, 5  ;;  %v770_v47 = vrot.slane %v768_v30, 4 }
 0x111   :  { %482 = vrot.lane.b32.xlu0 %v459_v56, %s2443_s2  ;;  %707 = vrot.lane.b32.xlu1 %v685_v60, %s2447_s13  ;;  %v2220_v15 = vpack.c.bf16 %v239_v4, %v239_v4  ;;  %v240_v40 = vmax.f32 %v219_v33, 0.0  ;;  %v549_v56 = vrot.slane %v547_v50, 4  ;;  %v546_v60 = vrot.slane %v544_v19, 4  ;;  %338 = vst.msk [vmem:[#allocation3 + $0x14] sm:$0xf] %vm242_vm2, %v329_v8 }
 0x112   :  { %2321 = vmatpush3.bf16.msra.mxu1 %v2382_v41  ;;  %339 = vst.msk [vmem:[#allocation3 + $0x18] sm:$0xf] %vm242_vm2, %v330_v6  ;;  %v688_v19 = vsel %vm2611_vm9, %v686_v2, %v687_v3  ;;  %v2383_v9 = vld [vmem:[%s3227_s3 + $0x20] ss:$0 sps:$4 sm:$0xff]   ;;  %v918_v10 = vld [vmem:[#allocation2 + $0x1c] sm:$0xf]  ;;  %v378_v54 = vsel %vm2611_vm9, %v376_v46, %v377_v53 }
 0x113   :  { %320 = vst.msk [vmem:[#allocation2 + $0x28] sm:$0xf] %vm242_vm2, %v2220_v15  ;;  %v2221_v49 = vpack.c.bf16 %v240_v40, %v240_v40  ;;  %2322 = vmatprep.subr.bf16.mxu1 %v2440_v1  ;;  %v548_v0 = vsel %vm2640_vm12, %v546_v60, %v547_v50  ;;  %v551_v4 = vsel %vm2640_vm12, %v549_v56, %v550_v57  ;;  %v331_v15 = vld [vmem:[#allocation2 + $0x1c] sm:$0xf]  ;;  %v332_v20 = vld [vmem:[#allocation2 + $0x20] sm:$0x7] }
 0x114   :  { %v223_v16 = vpop.f32.mrb[24].mxu0  ;;  %340 = vst.msk [vmem:[#allocation3 + $0x1c] sm:$0xf] %vm242_vm2, %v331_v15  ;;  %v1064_v22 = vsel %vm1062_vm14, %v2383_v9, 0  ;;  %v610_v23 = vld [vmem:[#allocation2 + $0x1c] sm:$0xf] }
 0x115   :  { %933 = vrot.lane.b32.xlu0 %v915_v7, %s2448_s14  ;;  %395 = vrot.lane.b32.xlu1 %v375_v11, %s2444_s10  ;;  %v2312_v27 = vpop.f32.mrb[25].mxu0  ;;  %v224_v36 = vadd.f32 %v2597_v13, %v223_v16  ;;  %v854_v13 = vrot.slane %v2716_v32, 7  ;;  %321 = vst.msk [vmem:[#allocation2 + $0x2c] sm:$0xf] %vm242_vm2, %v2221_v49  ;;  %v328_v7 = vld [vmem:[#allocation2 + $0x10] sm:$0xf] }
 0x116   :  { %v226_v59 = vpop.f32.mrb[26].mxu0  ;;  %337 = vst.msk [vmem:[#allocation3 + $0x10] sm:$0xf] %vm242_vm2, %v328_v7  ;;  %v432_v11 = vld [vmem:[#allocation2 + $0x14] sm:$0xf]  ;;  %2323 = vmatpush3.bf16.msra.mxu1 %v1064_v22  ;;  %v689_v26 = vrot.slane %v687_v3, 4 }
 0x117   :  { %v241_v45 = vmax.f32 %v224_v36, 0.0  ;;  %v855_v55 = vsel %vm2640_vm12, %v853_v44, %v854_v13  ;;  %v2313_v62 = vpop.f32.mrb[27].mxu0  ;;  %v665_v16 = vld [vmem:[#allocation2 + $0x18] sm:$0xf]  ;;  %341 = vst.msk [vmem:[#allocation3 + $0x20] sm:$0x7] %vm255_vm3, %v332_v20 }
 0x118   :  { %v464_v21 = vrot.slane %v432_v11, 6  ;;  %v348_v25 = vld [vmem:[#allocation2 + $0x18] sm:$0xf]  ;;  %v379_v29 = vrot.slane %v377_v53, 4  ;;  %v2788_v36 = vld [vmem:[#allocation2 + $0x1c] sm:$0xf] }
 0x119   :  { %627 = vrot.lane.b32.xlu0 %v607_v24, %s2445_s11  ;;  %484 = vrot.lane.b32.xlu1 %v462_v28, %s2443_s2  ;;  %v2222_v51 = vpack.c.bf16 %v241_v45, %v241_v45  ;;  %v690_v24 = vrot.slane %v665_v16, 5  ;;  %v380_v14 = vrot.slane %v348_v25, 5  ;;  %v433_v28 = vld [vmem:[#allocation2 + $0x18] sm:$0xf]  ;;  %v774_v45 = vrot.slane %v2788_v36, 6 }
 0x11a   :  { %v465_v27 = vsel %vm2606_vm8, %v463_v61, %v464_v21  ;;  %v917_v31 = vld [vmem:[#allocation2 + $0x18] sm:$0xf]  ;;  %v467_v35 = vrot.slane %v433_v28, 6  ;;  %v2797_v49 = vld [vmem:[#allocation2 + $0x1c] sm:$0xf]  ;;  %v856_v18 = vrot.slane %v854_v13, 4 }
 0x11b   :  { %323 = vst.msk [vmem:[#allocation2 + $0x30] sm:$0x1] %vm322_vm13, %v2222_v51  ;;  %v691_v63 = vsel %vm2611_vm9, %v689_v26, %v690_v24  ;;  %v746_v33 = vld [vmem:[#allocation2 + $0x18] sm:$0xf]  ;;  %v381_v34 = vsel %vm2611_vm9, %v379_v29, %v380_v14  ;;  %v860_v58 = vrot.slane %v2797_v49, 7  ;;  %v552_v32 = vrot.slane %v550_v57, 4 }
 0x11c   :  { %v771_v39 = vrot.slane %v746_v33, 6  ;;  %v609_v40 = vld [vmem:[#allocation2 + $0x18] sm:$0xf]  ;;  %v2810_v30 = vld [vmem:[#allocation2 + $0x1c] sm:$0xf]  ;;  %v382_v48 = vrot.slane %v380_v14, 4 }
 0x11d   :  { %791 = vrot.lane.b32.xlu0 %v766_v38, %s2449_s22  ;;  %793 = vrot.lane.b32.xlu1 %v769_v43, %s2449_s22  ;;  %v466_v38 = vrot.slane %v464_v21, 4  ;;  %v832_v41 = vld [vmem:[#allocation2 + $0x18] sm:$0xf]  ;;  %v556_v2 = vrot.slane %v2810_v30, 7  ;;  %v666_v3 = vld [vmem:[#allocation2 + $0x1c] sm:$0xf] }
 0x11e   :  { %v773_v44 = vrot.slane %v771_v39, 4  ;;  %v857_v50 = vrot.slane %v832_v41, 7  ;;  %v772_v51 = vsel %vm2606_vm8, %v770_v47, %v771_v39  ;;  %v693_v5 = vrot.slane %v666_v3, 5  ;;  %v349_v8 = vld [vmem:[#allocation2 + $0x1c] sm:$0xf] }
 0x11f   :  { %v468_v43 = vsel %vm2606_vm8, %v466_v38, %v467_v35  ;;  %v383_v57 = vrot.slane %v349_v8, 5  ;;  %v434_v46 = vld [vmem:[#allocation2 + $0x1c] sm:$0xf]  ;;  %v667_v53 = vld [vmem:[#allocation2 + $0x20] sm:$0xf]  ;;  %v776_v33 = vrot.slane %v774_v45, 4 }
 0x120   :  { %v859_v56 = vrot.slane %v857_v50, 4  ;;  %v858_v60 = vsel %vm2640_vm12, %v856_v18, %v857_v50  ;;  %v470_v11 = vrot.slane %v434_v46, 6  ;;  %v612_v15 = vld [vmem:[#allocation2 + $0x24] sm:$0xf]  ;;  %v695_v16 = vrot.slane %v693_v5, 4 }
 0x121   :  { %877 = vrot.lane.b32.xlu0 %v852_v52, %s2450_s23  ;;  %879 = vrot.lane.b32.xlu1 %v855_v55, %s2450_s23  ;;  %v521_v52 = vld [vmem:[#allocation2 + $0x18] sm:$0xf]  ;;  %v775_v55 = vsel %vm2606_vm8, %v773_v44, %v774_v45  ;;  %v384_v9 = vsel %vm2611_vm9, %v382_v48, %v383_v57  ;;  %v696_v20 = vrot.slane %v667_v53, 5  ;;  %v385_v22 = vrot.slane %v383_v57, 4  ;;  %v919_v25 = vld [vmem:[#allocation2 + $0x20] sm:$0xf] }
 0x122   :  { %v553_v59 = vrot.slane %v521_v52, 7  ;;  %v861_v62 = vsel %vm2640_vm12, %v859_v56, %v860_v58  ;;  %v748_v26 = vld [vmem:[#allocation2 + $0x20] sm:$0xf]  ;;  %v749_v28 = vld [vmem:[#allocation2 + $0x24] sm:$0xf]  ;;  %v862_v36 = vrot.slane %v860_v58, 4 }
 0x123   :  { %v697_v21 = vsel %vm2611_vm9, %v695_v16, %v696_v20  ;;  %v777_v29 = vrot.slane %v748_v26, 6  ;;  %v780_v39 = vrot.slane %v749_v28, 6  ;;  %v523_v44 = vld [vmem:[#allocation2 + $0x20] sm:$0xf]  ;;  %v668_v52 = vld [vmem:[#allocation2 + $0x24] sm:$0xf] }
 0x124   :  { %v554_v13 = vsel %vm2640_vm12, %v552_v32, %v553_v59  ;;  %v558_v49 = vrot.slane %v556_v2, 4  ;;  %v698_v3 = vrot.slane %v696_v20, 4  ;;  %v750_v32 = vld [vmem:[#allocation2 + $0x28] sm:$0xf]  ;;  %v837_v46 = vld [vmem:[#allocation2 + $0x2c] sm:$0xf] }
 0x125   :  { %571 = vrot.lane.b32.xlu0 %v548_v0, %s2446_s12  ;;  %573 = vrot.lane.b32.xlu1 %v551_v4, %s2446_s12  ;;  %v555_v0 = vrot.slane %v553_v59, 4  ;;  %v692_v4 = vrot.slane %v690_v24, 4  ;;  %v2848_v24 = vld [vmem:[#allocation2 + $0x20] sm:$0xf]  ;;  %v779_v38 = vrot.slane %v777_v29, 4  ;;  %v782_v8 = vrot.slane %v780_v39, 4 }
 0x126   :  { %v473_v14 = vrot.slane %v2848_v24, 6  ;;  %v872_v20 = vrot.slane %v837_v46, 7  ;;  %v436_v26 = vld [vmem:[#allocation2 + $0x24] sm:$0x1]  ;;  %v921_v28 = vld [vmem:[#allocation2 + $0x28] sm:$0xf] }
 0x127   :  { %v557_v7 = vsel %vm2640_vm12, %v555_v0, %v556_v2  ;;  %v694_v6 = vsel %vm2611_vm9, %v692_v4, %v693_v5  ;;  %v781_v45 = vsel %vm2606_vm8, %v779_v38, %v780_v39  ;;  %v2893_v4 = vld [vmem:[#allocation2 + $0x2c] sm:$0xf]  ;;  %v783_v5 = vrot.slane %v750_v32, 6 }
 0x128   :  { %vm594_vm2 = vcmask 257216   ;;  %vm650_vm3 = vcmask 322816   ;;  %vm741_vm13 = vcmask 387392   ;;  %vm827_vm14 = vcmask 452992  }
 0x129   :  { %709 = vrot.lane.b32.xlu0 %v688_v19, %s2447_s13  ;;  %939 = vrot.lane.b32.xlu1 %v918_v10, %s2448_s14  ;;  %v920_v19 = vld [vmem:[#allocation2 + $0x24] sm:$0xf]  ;;  %v469_v10 = vrot.slane %v467_v35, 4  ;;  %v785_v57 = vrot.slane %v783_v5, 4 }
 0x12b   :  { %v471_v61 = vsel %vm2606_vm8, %v469_v10, %v470_v11 }
 0x12d   :  { %397 = vrot.lane.b32.xlu0 %v378_v54, %s2444_s10  ;;  %633 = vrot.lane.b32.xlu1 %v610_v23, %s2445_s11  ;;  %v2839_v54 = vld [vmem:[#allocation2 + $0x20] sm:$0xf] }
 0x12e   :  { %v386_v23 = vrot.slane %v2839_v54, 5  ;;  %v752_v54 = vld [vmem:[#allocation2 + $0x30] sm:$0x1] }
 0x130   :  { %v388_v38 = vrot.slane %v386_v23, 4 }
 0x131   :  { %486 = vrot.lane.b32.xlu0 %v465_v27, %s2443_s2  ;;  %711 = vrot.lane.b32.xlu1 %v691_v63, %s2447_s13  ;;  %v387_v27 = vsel %vm2611_vm9, %v385_v22, %v386_v23  ;;  %v472_v63 = vrot.slane %v470_v11, 4  ;;  %v784_v11 = vsel %vm2606_vm8, %v782_v8, %v783_v5 }
 0x133   :  { %v474_v35 = vsel %vm2606_vm8, %v472_v63, %v473_v14 }
 0x135   :  { %937 = vrot.lane.b32.xlu0 %v917_v31, %s2448_s14  ;;  %399 = vrot.lane.b32.xlu1 %v381_v34, %s2444_s10  ;;  %v611_v31 = vld [vmem:[#allocation2 + $0x20] sm:$0xf] }
 0x136   :  { %v834_v34 = vld [vmem:[#allocation2 + $0x20] sm:$0xf] }
 0x137   :  { %v863_v41 = vrot.slane %v834_v34, 7  ;;  %v525_v34 = vld [vmem:[#allocation2 + $0x28] sm:$0x3] }
 0x139   :  { %631 = vrot.lane.b32.xlu0 %v609_v40, %s2445_s11  ;;  %488 = vrot.lane.b32.xlu1 %v468_v43, %s2443_s2  ;;  %v835_v40 = vld [vmem:[#allocation2 + $0x24] sm:$0xf]  ;;  %v778_v43 = vsel %vm2606_vm8, %v776_v33, %v777_v29  ;;  %v865_v47 = vrot.slane %v863_v41, 4  ;;  %v864_v56 = vsel %vm2640_vm12, %v862_v36, %v863_v41  ;;  %v922_v29 = vld [vmem:[#allocation2 + $0x2c] sm:$0xf]  ;;  %v476_v33 = vrot.slane %v436_v26, 6 }
 0x13a   :  { %v866_v50 = vrot.slane %v835_v40, 7  ;;  %v565_v41 = vrot.slane %v525_v34, 7  ;;  %v613_v36 = vld [vmem:[#allocation2 + $0x28] sm:$0x7] }
 0x13c   :  { %v867_v58 = vsel %vm2640_vm12, %v865_v47, %v866_v50  ;;  %v838_v47 = vld [vmem:[#allocation2 + $0x30] sm:$0x3] }
 0x13d   :  { %795 = vrot.lane.b32.xlu0 %v772_v51, %s2449_s22  ;;  %797 = vrot.lane.b32.xlu1 %v775_v55, %s2449_s22  ;;  %v2873_v51 = vld [vmem:[#allocation2 + $0x24] sm:$0xf]  ;;  %v559_v55 = vrot.slane %v523_v44, 7 }
 0x13e   :  { %v562_v59 = vrot.slane %v2873_v51, 7 }
 0x13f   :  { %v561_v18 = vrot.slane %v559_v55, 4  ;;  %v560_v0 = vsel %vm2640_vm12, %v558_v49, %v559_v55  ;;  %v874_v55 = vrot.slane %v872_v20, 4 }
 0x140   :  { %v564_v40 = vrot.slane %v562_v59, 4 }
 0x141   :  { %881 = vrot.lane.b32.xlu0 %v858_v60, %s2450_s23  ;;  %883 = vrot.lane.b32.xlu1 %v861_v62, %s2450_s23  ;;  %v699_v60 = vrot.slane %v668_v52, 5  ;;  %v2884_v62 = vld [vmem:[#allocation2 + $0x28] sm:$0xf]  ;;  %v563_v30 = vsel %vm2640_vm12, %v561_v18, %v562_v59  ;;  %v923_v18 = vld [vmem:[#allocation2 + $0x30] sm:$0x7] }
 0x143   :  { %v701_v2 = vrot.slane %v699_v60, 4 }
 0x145   :  { %575 = vrot.lane.b32.xlu0 %v554_v13, %s2446_s12  ;;  %577 = vrot.lane.b32.xlu1 %v557_v7, %s2446_s12  ;;  %v702_v13 = vrot.slane %v2884_v62, 5  ;;  %v700_v7 = vsel %vm2611_vm9, %v698_v3, %v699_v60 }
 0x147   :  { %v703_v48 = vsel %vm2611_vm9, %v701_v2, %v702_v13  ;;  %v704_v51 = vrot.slane %v702_v13, 4  ;;  %vm425_vm9 = vcmask 124992  }
 0x149   :  { %713 = vrot.lane.b32.xlu0 %v694_v6, %s2447_s13  ;;  %943 = vrot.lane.b32.xlu1 %v920_v19, %s2448_s14  ;;  %v836_v6 = vld [vmem:[#allocation2 + $0x28] sm:$0xf]  ;;  %v786_v19 = vrot.slane %v2893_v4, 6 }
 0x14a   :  { %v869_v10 = vrot.slane %v836_v6, 7 }
 0x14b   :  { %v787_v42 = vsel %vm2606_vm8, %v785_v57, %v786_v19  ;;  %v788_v44 = vrot.slane %v786_v19, 4 }
 0x14c   :  { %v871_v16 = vrot.slane %v869_v10, 4 }
 0x14d   :  { %401 = vrot.lane.b32.xlu0 %v384_v9, %s2444_s10  ;;  %637 = vrot.lane.b32.xlu1 %v612_v15, %s2445_s11  ;;  %v868_v15 = vrot.slane %v866_v50, 4 }
 0x14f   :  { %v870_v22 = vsel %vm2640_vm12, %v868_v15, %v869_v10 }
 0x151   :  { %490 = vrot.lane.b32.xlu0 %v471_v61, %s2443_s2  ;;  %715 = vrot.lane.b32.xlu1 %v697_v21, %s2447_s13 }
 0x155   :  { %941 = vrot.lane.b32.xlu0 %v919_v25, %s2448_s14  ;;  %403 = vrot.lane.b32.xlu1 %v387_v27, %s2444_s10  ;;  %v873_v25 = vsel %vm2640_vm12, %v871_v16, %v872_v20 }
 0x159   :  { %635 = vrot.lane.b32.xlu0 %v611_v31, %s2445_s11  ;;  %492 = vrot.lane.b32.xlu1 %v474_v35, %s2443_s2  ;;  %v475_v31 = vrot.slane %v473_v14, 4 }
 0x15b   :  { %v477_v24 = vsel %vm2606_vm8, %v475_v31, %v476_v33 }
 0x15d   :  { %799 = vrot.lane.b32.xlu0 %v778_v43, %s2449_s22  ;;  %801 = vrot.lane.b32.xlu1 %v781_v45, %s2449_s22  ;;  %v566_v43 = vsel %vm2640_vm12, %v564_v40, %v565_v41  ;;  %v789_v45 = vrot.slane %v752_v54, 6 }
 0x15f   :  { %v790_v49 = vsel %vm2606_vm8, %v788_v44, %v789_v45  ;;  %vm1046_vm8 = vcmask 588800  }
 0x161   :  { %885 = vrot.lane.b32.xlu0 %v864_v56, %s2450_s23  ;;  %887 = vrot.lane.b32.xlu1 %v867_v58, %s2450_s23  ;;  %v875_v56 = vrot.slane %v838_v47, 7 }
 0x163   :  { %v876_v60 = vsel %vm2640_vm12, %v874_v55, %v875_v56  ;;  %vm659_vm12 = vcmask 321792  }
 0x165   :  { %579 = vrot.lane.b32.xlu0 %v560_v0, %s2446_s12  ;;  %581 = vrot.lane.b32.xlu1 %v563_v30, %s2446_s12 }
 0x169   :  { %717 = vrot.lane.b32.xlu0 %v700_v7, %s2447_s13  ;;  %719 = vrot.lane.b32.xlu1 %v703_v48, %s2447_s13 }
 0x16b   :  { %v479_v53 = vpop.permute.xlu1 %478  ;;  %v390_v9 = vpop.permute.xlu0 %389 }
 0x16c   :  { %417 = vst.msk [vmem:[#allocation3] sm:$0xf] %vm416_vm15, %v390_v9 }
 0x16d   :  { %803 = vrot.lane.b32.xlu0 %v784_v11, %s2449_s22  ;;  %506 = vst.msk [vmem:[#allocation3] sm:$0xf] %vm505_vm1, %v479_v53  ;;  %805 = vrot.lane.b32.xlu1 %v787_v42, %s2449_s22 }
 0x16f   :  { %v624_v61 = vpop.permute.xlu0 %623  ;;  %v626_v21 = vpop.permute.xlu1 %625 }
 0x171   :  { %889 = vrot.lane.b32.xlu0 %v870_v22, %s2450_s23  ;;  %891 = vrot.lane.b32.xlu1 %v873_v25, %s2450_s23 }
 0x173   :  { %v392_v27 = vpop.permute.xlu0 %391  ;;  %v481_v63 = vpop.permute.xlu1 %480 }
 0x174   :  { %418 = vst.msk [vmem:[#allocation3 + $0x4] sm:$0xf] %vm416_vm15, %v392_v27 }
 0x175   :  { %507 = vst.msk [vmem:[#allocation3 + $0x4] sm:$0xf] %vm505_vm1, %v481_v63  ;;  %945 = vrot.lane.b32.xlu0 %v921_v28, %s2448_s14  ;;  %947 = vrot.lane.b32.xlu1 %v922_v29, %s2448_s14 }
 0x177   :  { %v568_v35 = vpop.permute.xlu0 %567  ;;  %v570_v39 = vpop.permute.xlu1 %569 }
 0x178   :  { %595 = vst.msk [vmem:[#allocation3] sm:$0xf] %vm594_vm2, %v568_v35  ;;  %596 = vst.msk [vmem:[#allocation3 + $0x4] sm:$0xf] %vm594_vm2, %v570_v39 }
 0x179   :  { %405 = vrot.lane.b32.xlu0 %v388_v38, %s2444_s10  ;;  %651 = vst.msk [vmem:[#allocation3] sm:$0xf] %vm650_vm3, %v624_v61  ;;  %494 = vrot.lane.b32.xlu1 %v477_v24, %s2443_s2  ;;  %652 = vst.msk [vmem:[#allocation3 + $0x4] sm:$0xf] %vm650_vm3, %v626_v21 }
 0x17b   :  { %v706_v23 = vpop.permute.xlu0 %705  ;;  %v936_v14 = vpop.permute.xlu1 %935 }
 0x17c   :  { %733 = vst.msk [vmem:[#allocation3] sm:$0xf] %vm732_vm4, %v706_v23 }
 0x17d   :  { %583 = vrot.lane.b32.xlu0 %v566_v43, %s2446_s12  ;;  %639 = vrot.lane.b32.xlu1 %v613_v36, %s2445_s11 }
 0x17f   :  { %v394_v50 = vpop.permute.xlu0 %393  ;;  %v630_v52 = vpop.permute.xlu1 %629 }
 0x180   :  { %419 = vst.msk [vmem:[#allocation3 + $0x8] sm:$0xf] %vm416_vm15, %v394_v50 }
 0x181   :  { %721 = vrot.lane.b32.xlu0 %v704_v51, %s2447_s13  ;;  %807 = vrot.lane.b32.xlu1 %v790_v49, %s2449_s22 }
 0x183   :  { %v483_v58 = vpop.permute.xlu0 %482  ;;  %v708_v59 = vpop.permute.xlu1 %707 }
 0x184   :  { %508 = vst.msk [vmem:[#allocation3 + $0x8] sm:$0xf] %vm505_vm1, %v483_v58 }
 0x185   :  { %734 = vst.msk [vmem:[#allocation3 + $0x4] sm:$0xf] %vm732_vm4, %v708_v59  ;;  %893 = vrot.lane.b32.xlu0 %v876_v60, %s2450_s23  ;;  %949 = vrot.lane.b32.xlu1 %v923_v18, %s2448_s14 }
 0x187   :  { %v934_v62 = vpop.permute.xlu0 %933  ;;  %v396_v0 = vpop.permute.xlu1 %395 }
 0x188   :  { %420 = vst.msk [vmem:[#allocation3 + $0xc] sm:$0xf] %vm416_vm15, %v396_v0  ;;  %v3020_v0 = vld [vmem:[%s3228_s4] ss:$0 sm:$0xff]  ;;  %s2452_s4 = smov 80  }
 0x18b   :  { %v628_v37 = vpop.permute.xlu0 %627  ;;  %v485_v3 = vpop.permute.xlu1 %484 }
 0x18c   :  { %509 = vst.msk [vmem:[#allocation3 + $0xc] sm:$0xf] %vm505_vm1, %v485_v3 }
 0x18f   :  { %v792_v32 = vpop.permute.xlu0 %791  ;;  %v794_v17 = vpop.permute.xlu1 %793 }
 0x190   :  { %819 = vst.msk [vmem:[#allocation3] sm:$0xf] %vm818_vm5, %v792_v32  ;;  %820 = vst.msk [vmem:[#allocation3 + $0x4] sm:$0xf] %vm818_vm5, %v794_v17 }
 0x193   :  { %v878_v30 = vpop.permute.xlu0 %877  ;;  %v880_v2 = vpop.permute.xlu1 %879 }
 0x194   :  { %905 = vst.msk [vmem:[#allocation3] sm:$0xf] %vm904_vm6, %v878_v30  ;;  %906 = vst.msk [vmem:[#allocation3 + $0x4] sm:$0xf] %vm904_vm6, %v880_v2 }
 0x195   :  { %961 = vst.msk [vmem:[#allocation3] sm:$0xf] %vm960_vm7, %v934_v62  ;;  %962 = vst.msk [vmem:[#allocation3 + $0x4] sm:$0xf] %vm960_vm7, %v936_v14 }
 0x197   :  { %v572_v13 = vpop.permute.xlu0 %571  ;;  %v574_v4 = vpop.permute.xlu1 %573 }
 0x198   :  { %597 = vst.msk [vmem:[#allocation3 + $0x8] sm:$0xf] %vm594_vm2, %v572_v13  ;;  %598 = vst.msk [vmem:[#allocation3 + $0xc] sm:$0xf] %vm594_vm2, %v574_v4  ;;  %v2451_v4 = vmov 1966171168  }
 0x199   :  { %653 = vst.msk [vmem:[#allocation3 + $0x8] sm:$0xf] %vm650_vm3, %v628_v37  ;;  %654 = vst.msk [vmem:[#allocation3 + $0xc] sm:$0xf] %vm650_vm3, %v630_v52 }
 0x19b   :  { %v710_v5 = vpop.permute.xlu0 %709  ;;  %v940_v7 = vpop.permute.xlu1 %939 }
 0x19c   :  { %735 = vst.msk [vmem:[#allocation3 + $0x8] sm:$0xf] %vm732_vm4, %v710_v5  ;;  %v2384_v8 = vld [vmem:[#allocation3] sm:$0xff]   ;;  %v1209_v5 = vunpack.c.l.s4 %v2451_v4 }
 0x19d   :  { %2325 = vmatmul.mubr.msk.bf16.vlgmr.msra.gmra.mrb[0].mxu1 %vm1046_vm8, %v2384_v8 }
 0x19e   :  { %2328 = vmatprep.mubr.msk.bf16.mxu1 %vm2441_vm0, %v2440_v1 }
 0x19f   :  { %v398_v6 = vpop.permute.xlu0 %397  ;;  %v634_v48 = vpop.permute.xlu1 %633 }
 0x1a0   :  { %421 = vst.msk [vmem:[#allocation3 + $0x10] sm:$0xf] %vm416_vm15, %v398_v6 }
 0x1a3   :  { %v487_v57 = vpop.permute.xlu0 %486  ;;  %v712_v19 = vpop.permute.xlu1 %711 }
 0x1a4   :  { %510 = vst.msk [vmem:[#allocation3 + $0x10] sm:$0xf] %vm505_vm1, %v487_v57  ;;  %v1210_v57 = vunpack.c.0.s8 %v1209_v5 }
 0x1a5   :  { %736 = vst.msk [vmem:[#allocation3 + $0xc] sm:$0xf] %vm732_vm4, %v712_v19 }
 0x1a7   :  { %v938_v46 = vpop.permute.xlu0 %937  ;;  %v400_v53 = vpop.permute.xlu1 %399 }
 0x1a8   :  { %422 = vst.msk [vmem:[#allocation3 + $0x14] sm:$0xf] %vm416_vm15, %v400_v53 }
 0x1ab   :  { %v632_v9 = vpop.permute.xlu0 %631  ;;  %v489_v10 = vpop.permute.xlu1 %488 }
 0x1ac   :  { %511 = vst.msk [vmem:[#allocation3 + $0x14] sm:$0xf] %vm505_vm1, %v489_v10 }
 0x1af   :  { %v796_v11 = vpop.permute.xlu0 %795  ;;  %v798_v15 = vpop.permute.xlu1 %797 }
 0x1b0   :  { %821 = vst.msk [vmem:[#allocation3 + $0x8] sm:$0xf] %vm818_vm5, %v796_v11  ;;  %822 = vst.msk [vmem:[#allocation3 + $0xc] sm:$0xf] %vm818_vm5, %v798_v15 }
 0x1b3   :  { %v882_v42 = vpop.permute.xlu0 %881  ;;  %v884_v16 = vpop.permute.xlu1 %883 }
 0x1b4   :  { %907 = vst.msk [vmem:[#allocation3 + $0x8] sm:$0xf] %vm904_vm6, %v882_v42  ;;  %908 = vst.msk [vmem:[#allocation3 + $0xc] sm:$0xf] %vm904_vm6, %v884_v16 }
 0x1b5   :  { %963 = vst.msk [vmem:[#allocation3 + $0x8] sm:$0xf] %vm960_vm7, %v938_v46  ;;  %964 = vst.msk [vmem:[#allocation3 + $0xc] sm:$0xf] %vm960_vm7, %v940_v7  ;;  %v1211_v7 = vlaneseq }
 0x1b7   :  { %v576_v20 = vpop.permute.xlu0 %575  ;;  %v578_v61 = vpop.permute.xlu1 %577  ;;  %v1212_v19 = vshrl.u32 %v1211_v7, 7  ;;  %v2390_v7 = vld [vmem:[%s3229_s5 + $0x88] sm:$0xff]  }
 0x1b8   :  { %599 = vst.msk [vmem:[#allocation3 + $0x10] sm:$0xf] %vm594_vm2, %v576_v20  ;;  %600 = vst.msk [vmem:[#allocation3 + $0x14] sm:$0xf] %vm594_vm2, %v578_v61 }
 0x1b9   :  { %655 = vst.msk [vmem:[#allocation3 + $0x10] sm:$0xf] %vm650_vm3, %v632_v9  ;;  %656 = vst.msk [vmem:[#allocation3 + $0x14] sm:$0xf] %vm650_vm3, %v634_v48  ;;  %v3026_v46 = vsub.s32 %v1210_v57, %v1212_v19  ;;  %v2391_v57 = vld [vmem:[%s3229_s5 + $0x40] sm:$0xff]  }
 0x1ba   :  { %v2392_v19 = vld [vmem:[%s3229_s5] sm:$0xff]   ;;  %2253 = vmatprep.subr.bf16.mxu1 %v2391_v57 }
 0x1bb   :  { %v714_v21 = vpop.permute.xlu0 %713  ;;  %v944_v22 = vpop.permute.xlu1 %943  ;;  %2254 = vmatpush3.bf16.msra.mxu1 %v2392_v19 }
 0x1bc   :  { %737 = vst.msk [vmem:[#allocation3 + $0x10] sm:$0xf] %vm732_vm4, %v714_v21  ;;  %v2385_v25 = vld [vmem:[#allocation3 + $0x8] sm:$0xff]  }
 0x1bd   :  { %2329 = vmatmul.mubr.msk.bf16.gmra.mrb[4].mxu1 %vm1046_vm8, %v2385_v25 }
 0x1be   :  { %2332 = vmatprep.mubr.msk.bf16.mxu1 %vm2441_vm0, %v2440_v1 }
 0x1bf   :  { %v402_v26 = vpop.permute.xlu0 %401  ;;  %v638_v27 = vpop.permute.xlu1 %637 }
 0x1c0   :  { %423 = vst.msk [vmem:[#allocation3 + $0x18] sm:$0xf] %vm416_vm15, %v402_v26 }
 0x1c3   :  { %v491_v63 = vpop.permute.xlu0 %490  ;;  %v716_v28 = vpop.permute.xlu1 %715 }
 0x1c4   :  { %512 = vst.msk [vmem:[#allocation3 + $0x18] sm:$0xf] %vm505_vm1, %v491_v63 }
 0x1c5   :  { %738 = vst.msk [vmem:[#allocation3 + $0x14] sm:$0xf] %vm732_vm4, %v716_v28 }
 0x1c7   :  { %v942_v29 = vpop.permute.xlu0 %941  ;;  %v404_v31 = vpop.permute.xlu1 %403 }
 0x1c8   :  { %424 = vst.msk [vmem:[#allocation3 + $0x1c] sm:$0xf] %vm416_vm15, %v404_v31  ;;  %vm913_vm15 = vcmask 518592  }
 0x1cb   :  { %v636_v33 = vpop.permute.xlu0 %635  ;;  %v493_v34 = vpop.permute.xlu1 %492 }
 0x1cc   :  { %513 = vst.msk [vmem:[#allocation3 + $0x1c] sm:$0xf] %vm505_vm1, %v493_v34  ;;  %vm969_vm1 = vcmask 584192  }
 0x1cf   :  { %v800_v35 = vpop.permute.xlu0 %799  ;;  %v802_v38 = vpop.permute.xlu1 %801 }
 0x1d0   :  { %823 = vst.msk [vmem:[#allocation3 + $0x10] sm:$0xf] %vm818_vm5, %v800_v35  ;;  %824 = vst.msk [vmem:[#allocation3 + $0x14] sm:$0xf] %vm818_vm5, %v802_v38 }
 0x1d3   :  { %v886_v39 = vpop.permute.xlu0 %885  ;;  %v888_v40 = vpop.permute.xlu1 %887 }
 0x1d4   :  { %909 = vst.msk [vmem:[#allocation3 + $0x10] sm:$0xf] %vm904_vm6, %v886_v39  ;;  %910 = vst.msk [vmem:[#allocation3 + $0x14] sm:$0xf] %vm904_vm6, %v888_v40 }
 0x1d5   :  { %965 = vst.msk [vmem:[#allocation3 + $0x10] sm:$0xf] %vm960_vm7, %v942_v29  ;;  %966 = vst.msk [vmem:[#allocation3 + $0x14] sm:$0xf] %vm960_vm7, %v944_v22 }
 0x1d7   :  { %v580_v41 = vpop.permute.xlu0 %579  ;;  %v582_v24 = vpop.permute.xlu1 %581 }
 0x1d8   :  { %601 = vst.msk [vmem:[#allocation3 + $0x18] sm:$0xf] %vm594_vm2, %v580_v41  ;;  %602 = vst.msk [vmem:[#allocation3 + $0x1c] sm:$0xf] %vm594_vm2, %v582_v24  ;;  %vm1184_vm2 = vcmask 125952  }
 0x1d9   :  { %657 = vst.msk [vmem:[#allocation3 + $0x18] sm:$0xf] %vm650_vm3, %v636_v33  ;;  %658 = vst.msk [vmem:[#allocation3 + $0x1c] sm:$0xf] %vm650_vm3, %v638_v27  ;;  %vm1196_vm3 = vcmask 122880  }
 0x1db   :  { %v718_v54 = vpop.permute.xlu0 %717  ;;  %v720_v23 = vpop.permute.xlu1 %719 }
 0x1dc   :  { %739 = vst.msk [vmem:[#allocation3 + $0x18] sm:$0xf] %vm732_vm4, %v718_v54  ;;  %740 = vst.msk [vmem:[#allocation3 + $0x1c] sm:$0xf] %vm732_vm4, %v720_v23  ;;  %v2386_v14 = vld [vmem:[#allocation3 + $0x10] sm:$0xff]   ;;  %vm1193_vm4 = vcmask 124928  }
 0x1dd   :  { %2333 = vmatmul.mubr.msk.bf16.gmra.mrb[8].mxu1 %vm1046_vm8, %v2386_v14  ;;  %v2389_v14 = vld [vmem:[%s3229_s5 + $0x80] sm:$0xff]  }
 0x1de   :  { %2336 = vmatprep.mubr.msk.bf16.mxu1 %vm2441_vm0, %v2440_v1  ;;  %1968 = vmatpush1.bf16.msra.mxu0 %v2389_v14 }
 0x1df   :  { %v804_v43 = vpop.permute.xlu0 %803  ;;  %v806_v36 = vpop.permute.xlu1 %805  ;;  %1969 = vmatprep.subr.bf16.mxu0 %v2442_v12 }
 0x1e0   :  { %825 = vst.msk [vmem:[#allocation3 + $0x18] sm:$0xf] %vm818_vm5, %v804_v43  ;;  %826 = vst.msk [vmem:[#allocation3 + $0x1c] sm:$0xf] %vm818_vm5, %v806_v36  ;;  %vm1218_vm5 = vcmask 254080  }
 0x1e2   :  { %1970 = vmatpush1.bf16.msra.mxu0 %v2390_v7  ;;  %v2409_v7 = vld [vmem:[%s3229_s5 + $0x30] sm:$0xff]  }
 0x1e3   :  { %v890_v44 = vpop.permute.xlu0 %889  ;;  %v892_v45 = vpop.permute.xlu1 %891  ;;  %1971 = vmatprep.subr.bf16.mxu0 %v2442_v12 }
 0x1e4   :  { %911 = vst.msk [vmem:[#allocation3 + $0x18] sm:$0xf] %vm904_vm6, %v890_v44  ;;  %912 = vst.msk [vmem:[#allocation3 + $0x1c] sm:$0xf] %vm904_vm6, %v892_v45  ;;  %vm1240_vm6 = vcmask 385280  }
 0x1e7   :  { %v946_v47 = vpop.permute.xlu0 %945  ;;  %v948_v50 = vpop.permute.xlu1 %947 }
 0x1e8   :  { %967 = vst.msk [vmem:[#allocation3 + $0x18] sm:$0xf] %vm960_vm7, %v946_v47  ;;  %968 = vst.msk [vmem:[#allocation3 + $0x1c] sm:$0xf] %vm960_vm7, %v948_v50  ;;  %vm1263_vm7 = vcmask 516480  }
 0x1eb   :  { %v406_v51 = vpop.permute.xlu0 %405  ;;  %v495_v52 = vpop.permute.xlu1 %494 }
 0x1ec   :  { %426 = vst.msk [vmem:[#allocation3 + $0x20] sm:$0x7] %vm425_vm9, %v406_v51  ;;  %vm1307_vm9 = vcmask 778880  }
 0x1ed   :  { %515 = vst.msk [vmem:[#allocation3 + $0x20] sm:$0x7] %vm514_vm10, %v495_v52  ;;  %vm1328_vm10 = vcmask 910080  }
 0x1ef   :  { %v584_v55 = vpop.permute.xlu0 %583  ;;  %v640_v56 = vpop.permute.xlu1 %639  ;;  %v2387_v49 = vld [vmem:[#allocation3 + $0x18] sm:$0xff]  }
 0x1f0   :  { %604 = vst.msk [vmem:[#allocation3 + $0x20] sm:$0x7] %vm603_vm11, %v584_v55  ;;  %2337 = vmatmul.mubr.msk.bf16.gmra.mrb[12].mxu1 %vm1046_vm8, %v2387_v49  ;;  %vm1350_vm11 = vcmask 1041280  }
 0x1f1   :  { %660 = vst.msk [vmem:[#allocation3 + $0x20] sm:$0x7] %vm659_vm12, %v640_v56  ;;  %2340 = vmatprep.mubr.msk.bf16.mxu1 %vm2441_vm0, %v2440_v1  ;;  %vm1923_vm12 = vcmask 130048  }
 0x1f3   :  { %v722_v58 = vpop.permute.xlu0 %721  ;;  %v808_v18 = vpop.permute.xlu1 %807 }
 0x1f4   :  { %742 = vst.msk [vmem:[#allocation3 + $0x20] sm:$0x7] %vm741_vm13, %v722_v58  ;;  %vm2076_vm13 = vcmask 140288  }
 0x1f5   :  { %828 = vst.msk [vmem:[#allocation3 + $0x20] sm:$0x7] %vm827_vm14, %v808_v18 }
 0x1f7   :  { %v894_v59 = vpop.permute.xlu0 %893  ;;  %v950_v60 = vpop.permute.xlu1 %949 }
 0x1f8   :  { %914 = vst.msk [vmem:[#allocation3 + $0x20] sm:$0x7] %vm913_vm15, %v894_v59 }
 0x1f9   :  { %970 = vst.msk [vmem:[#allocation3 + $0x20] sm:$0x7] %vm969_vm1, %v950_v60 }
 0x200   :  { %v2388_v62 = vld [vmem:[#allocation3 + $0x20] ss:$0 sps:$4 sm:$0x77]  }
 0x201   :  { %2341 = vmatmul.mubr.msk.bf16.gmra.mrb[16].mxu1 %vm1046_vm8, %v2388_v62  ;;  %vm1284_vm8 = vcmask 647680  }
 0x270   :  { %v1100_v37 = vpop.f32.mrb[0].mxu1 }
 0x271   :  { %v1101_v3 = vadd.f32 %v3020_v0, %v1100_v37  ;;  %v2326_v32 = vpop.f32.mrb[1].mxu1 }
 0x272   :  { %v1103_v17 = vpop.f32.mrb[2].mxu1 }
 0x273   :  { %v1138_v30 = vmax.f32 %v1101_v3, 0.0  ;;  %v1104_v2 = vadd.f32 %v3020_v0, %v1103_v17  ;;  %v2327_v13 = vpop.f32.mrb[3].mxu1 }
 0x275   :  { %v2223_v8 = vpack.c.bf16 %v1138_v30, %v1138_v30  ;;  %v1139_v6 = vmax.f32 %v1104_v2, 0.0 }
 0x277   :  { %1185 = vst.msk [vmem:[#allocation4] sm:$0xf] %vm1184_vm2, %v2223_v8  ;;  %v2224_v48 = vpack.c.bf16 %v1139_v6, %v1139_v6 }
 0x279   :  { %1186 = vst.msk [vmem:[#allocation4 + $0x4] sm:$0xf] %vm1184_vm2, %v2224_v48 }
 0x27e   :  { %v2155_v53 = vld.sshfl [vmem:[#allocation4] sm:$0x10 pattern:$0x75316420]  ;;  %v1195_v9 = vld [vmem:[#allocation4] sm:$0x1] }
 0x27f   :  { %v1207_v10 = vcombine.high %v2155_v53, %v2155_v53  ;;  %v2156_v11 = vld.sshfl [vmem:[#allocation4] sm:$0x2 pattern:$0x75316420]  ;;  %1197 = vst.msk [vmem:[#allocation5] sm:$0x1] %vm1196_vm3, %v1195_v9 }
 0x280   :  { %v1235_v15 = vrot.slane %v2156_v11, %v3026_v46  ;;  %v2157_v42 = vld.sshfl [vmem:[#allocation4] sm:$0x20 pattern:$0x75316420]  ;;  %v2393_v53 = vld [vmem:[%s3229_s5 + $0x90] sm:$0xff]   ;;  %v2394_v9 = vld [vmem:[%s3229_s5 + $0x48] sm:$0xff]  }
 0x281   :  { %v1214_v16 = vrot.slane %v1207_v10, %v3026_v46  ;;  %v1251_v20 = vcombine.high %v2157_v42, %v2157_v42  ;;  %v2159_v21 = vld.sshfl [vmem:[#allocation4 + $0x4] sm:$0x20 pattern:$0x75316420]  ;;  %1972 = vmatpush1.bf16.msra.mxu0 %v2393_v53  ;;  %v2395_v10 = vld [vmem:[%s3229_s5 + $0x8] sm:$0xff]   ;;  %2255 = vmatprep.subr.bf16.mxu1 %v2394_v9 }
 0x282   :  { %v1236_v61 = vcombine.high %v1235_v15, %v1235_v15  ;;  %v2158_v25 = vld.sshfl [vmem:[#allocation4 + $0x4] sm:$0x1 pattern:$0x75316420]  ;;  %v1295_v26 = vcombine.high %v2159_v21, %v2159_v21  ;;  %1973 = vmatprep.subr.bf16.mxu0 %v2442_v12  ;;  %v2397_v15 = vld [vmem:[%s3229_s5 + $0x50] sm:$0xff]   ;;  %2256 = vmatpush3.bf16.msra.mxu1 %v2395_v10 }
 0x283   :  { %1215 = vrot.lane.b32.xlu0 %v1214_v16, %s2443_s2  ;;  %v1258_v22 = vrot.slane %v1251_v20, %v3026_v46  ;;  %v1280_v28 = vrot.slane %v2158_v25, %v3026_v46  ;;  %v2396_v11 = vld [vmem:[%s3229_s5 + $0x98] sm:$0xff]   ;;  %v2400_v16 = vld [vmem:[%s3229_s5 + $0xa0] sm:$0xff]   ;;  %v2398_v21 = vld [vmem:[%s3229_s5 + $0x10] sm:$0xff]   ;;  %2257 = vmatprep.subr.bf16.mxu1 %v2397_v15 }
 0x284   :  { %1237 = vrot.lane.b32.xlu1 %v1236_v61, %s2445_s11  ;;  %v1302_v63 = vrot.slane %v1295_v26, %v3026_v46  ;;  %v2399_v26 = vld [vmem:[%s3229_s5 + $0x58] sm:$0xff]  }
 0x285   :  { %v1259_v27 = vcombine.high %v1258_v22, %v1258_v22  ;;  %1974 = vmatpush1.bf16.msra.mxu0 %v2396_v11  ;;  %v2410_v9 = vld [vmem:[%s3229_s5 + $0xb8] sm:$0xff]  }
 0x286   :  { %v1303_v29 = vcombine.high %v1302_v63, %v1302_v63  ;;  %1975 = vmatprep.subr.bf16.mxu0 %v2442_v12  ;;  %2258 = vmatpush3.bf16.msra.mxu1 %v2398_v21  ;;  %v2411_v10 = vld [vmem:[%s3229_s5 + $0x78] sm:$0xff]  }
 0x287   :  { %1260 = vrot.lane.b32.xlu0 %v1259_v27, %s2449_s22  ;;  %2259 = vmatprep.subr.bf16.mxu1 %v2399_v26  ;;  %v2412_v15 = vld [vmem:[%s3229_s5 + $0x38] sm:$0xff]  }
 0x288   :  { %1281 = vrot.lane.b32.xlu1 %v1280_v28, %s2448_s14 }
 0x289   :  { %1976 = vmatpush1.bf16.msra.mxu0 %v2400_v16 }
 0x28a   :  { %1977 = vmatprep.subr.bf16.mxu0 %v2442_v12 }
 0x28b   :  { %1304 = vrot.lane.b32.xlu0 %v1303_v29, %s2452_s4 }
 0x290   :  { %v1108_v31 = vpop.f32.mrb[4].mxu1 }
 0x291   :  { %v1109_v33 = vadd.f32 %v3020_v0, %v1108_v31  ;;  %v2330_v34 = vpop.f32.mrb[5].mxu1 }
 0x292   :  { %v1111_v35 = vpop.f32.mrb[6].mxu1 }
 0x293   :  { %v1140_v38 = vmax.f32 %v1109_v33, 0.0  ;;  %v1112_v39 = vadd.f32 %v3020_v0, %v1111_v35  ;;  %v2331_v40 = vpop.f32.mrb[7].mxu1 }
 0x295   :  { %v2225_v41 = vpack.c.bf16 %v1140_v38, %v1140_v38  ;;  %v1141_v24 = vmax.f32 %v1112_v39, 0.0 }
 0x297   :  { %1187 = vst.msk [vmem:[#allocation4 + $0x8] sm:$0xf] %vm1184_vm2, %v2225_v41  ;;  %v2226_v54 = vpack.c.bf16 %v1141_v24, %v1141_v24 }
 0x299   :  { %1188 = vst.msk [vmem:[#allocation4 + $0xc] sm:$0xf] %vm1184_vm2, %v2226_v54 }
 0x29e   :  { %v2160_v23 = vld.sshfl [vmem:[#allocation4 + $0x8] sm:$0x1 pattern:$0x75316420] }
 0x29f   :  { %v1324_v43 = vrot.slane %v2160_v23, %v3026_v46  ;;  %v2161_v36 = vld.sshfl [vmem:[#allocation4 + $0x8] sm:$0x10 pattern:$0x75316420] }
 0x2a0   :  { %v1339_v44 = vcombine.high %v2161_v36, %v2161_v36  ;;  %v2163_v45 = vld.sshfl [vmem:[#allocation4 + $0x8] sm:$0x20 pattern:$0x75316420]  ;;  %v2401_v36 = vld [vmem:[%s3229_s5 + $0x18] sm:$0xff]  }
 0x2a1   :  { %1325 = vrot.lane.b32.xlu1 %v1324_v43, %s2453_s29  ;;  %v1380_v47 = vcombine.high %v2163_v45, %v2163_v45  ;;  %v2164_v50 = vld.sshfl [vmem:[#allocation4 + $0xc] sm:$0x2 pattern:$0x75316420]  ;;  %2260 = vmatpush3.bf16.msra.mxu1 %v2401_v36 }
 0x2a2   :  { %v1346_v51 = vrot.slane %v1339_v44, %v3026_v46  ;;  %v1408_v52 = vrot.slane %v2164_v50, %v3026_v46  ;;  %v2165_v55 = vld.sshfl [vmem:[#allocation4 + $0xc] sm:$0x20 pattern:$0x75316420] }
 0x2a3   :  { %v1387_v56 = vrot.slane %v1380_v47, %v3026_v46  ;;  %v1423_v49 = vcombine.high %v2165_v55, %v2165_v55  ;;  %v2162_v58 = vld.sshfl [vmem:[#allocation4 + $0x8] sm:$0x2 pattern:$0x75316420]  ;;  %v2405_v55 = vld [vmem:[%s3229_s5 + $0x68] sm:$0xff]  }
 0x2a4   :  { %1347 = vrot.lane.b32.xlu0 %v1346_v51, %s2454_s0  ;;  %v1367_v18 = vrot.slane %v2162_v58, %v3026_v46  ;;  %v1409_v62 = vcombine.high %v1408_v52, %v1408_v52  ;;  %v2402_v50 = vld [vmem:[%s3229_s5 + $0x60] sm:$0xff]   ;;  %v2404_v52 = vld [vmem:[%s3229_s5 + $0xa8] sm:$0xff]  }
 0x2a5   :  { %v1388_v59 = vcombine.high %v1387_v56, %v1387_v56  ;;  %v1430_v60 = vrot.slane %v1423_v49, %v3026_v46  ;;  %v2403_v51 = vld [vmem:[%s3229_s5 + $0x20] sm:$0xff]   ;;  %2261 = vmatprep.subr.bf16.mxu1 %v2402_v50  ;;  %1978 = vmatpush1.bf16.msra.mxu0 %v2404_v52 }
 0x2a6   :  { %v1368_v37 = vcombine.high %v1367_v18, %v1367_v18  ;;  %2262 = vmatpush3.bf16.msra.mxu1 %v2403_v51  ;;  %1979 = vmatprep.subr.bf16.mxu0 %v2442_v12  ;;  %v2406_v18 = vld [vmem:[%s3229_s5 + $0x28] sm:$0xff]  }
 0x2a7   :  { %1389 = vrot.lane.b32.xlu1 %v1388_v59, %s2443_s2  ;;  %v1431_v3 = vcombine.high %v1430_v60, %v1430_v60  ;;  %2263 = vmatprep.subr.bf16.mxu1 %v2405_v55 }
 0x2a8   :  { %1410 = vrot.lane.b32.xlu0 %v1409_v62, %s2445_s11  ;;  %1370 = vst.msk [vmem:[#allocation5 + $0x1] sm:$0x1] %vm1196_vm3, %v1368_v37  ;;  %v2407_v37 = vld [vmem:[%s3229_s5 + $0xb0] sm:$0xff]  }
 0x2a9   :  { %1980 = vmatpush1.bf16.msra.mxu0 %v2407_v37 }
 0x2aa   :  { %2264 = vmatpush3.bf16.msra.mxu1 %v2406_v18  ;;  %1981 = vmatprep.subr.bf16.mxu0 %v2442_v12 }
 0x2ab   :  { %1432 = vrot.lane.b32.xlu1 %v1431_v3, %s2449_s22 }
 0x2ad   :  { %1982 = vmatpush1.bf16.msra.mxu0 %v2410_v9 }
 0x2ae   :  { %1983 = vmatprep.subr.bf16.mxu0 %v2442_v12 }
 0x2b0   :  { %v1116_v32 = vpop.f32.mrb[8].mxu1 }
 0x2b1   :  { %v1117_v17 = vadd.f32 %v3020_v0, %v1116_v32  ;;  %v2334_v30 = vpop.f32.mrb[9].mxu1 }
 0x2b2   :  { %v1119_v2 = vpop.f32.mrb[10].mxu1  ;;  %v2408_v30 = vld [vmem:[%s3229_s5 + $0x70] sm:$0xff]  }
 0x2b3   :  { %v1142_v13 = vmax.f32 %v1117_v17, 0.0  ;;  %v1120_v4 = vadd.f32 %v3020_v0, %v1119_v2  ;;  %v2335_v5 = vpop.f32.mrb[11].mxu1  ;;  %2265 = vmatprep.subr.bf16.mxu1 %v2408_v30 }
 0x2b4   :  { %2266 = vmatpush3.bf16.msra.mxu1 %v2409_v7 }
 0x2b5   :  { %v2227_v8 = vpack.c.bf16 %v1142_v13, %v1142_v13  ;;  %v1143_v6 = vmax.f32 %v1120_v4, 0.0  ;;  %2267 = vmatprep.subr.bf16.mxu1 %v2411_v10 }
 0x2b7   :  { %1189 = vst.msk [vmem:[#allocation4 + $0x10] sm:$0xf] %vm1184_vm2, %v2227_v8  ;;  %v2228_v48 = vpack.c.bf16 %v1143_v6, %v1143_v6 }
 0x2b8   :  { %2268 = vmatpush3.bf16.msra.mxu1 %v2412_v15 }
 0x2b9   :  { %1190 = vst.msk [vmem:[#allocation4 + $0x14] sm:$0xf] %vm1184_vm2, %v2228_v48  ;;  %2344 = vmatprep.subr.bf16.mxu1 %v2440_v1 }
 0x2be   :  { %v2166_v42 = vld.sshfl [vmem:[#allocation4 + $0x10] sm:$0x1 pattern:$0x75316420] }
 0x2bf   :  { %v1451_v20 = vrot.slane %v2166_v42, %v3026_v46  ;;  %v2167_v61 = vld.sshfl [vmem:[#allocation4 + $0x10] sm:$0x10 pattern:$0x75316420] }
 0x2c0   :  { %v1465_v22 = vcombine.high %v2167_v61, %v2167_v61  ;;  %v2168_v25 = vld.sshfl [vmem:[#allocation4 + $0x10] sm:$0x2 pattern:$0x75316420] }
 0x2c1   :  { %1452 = vrot.lane.b32.xlu0 %v1451_v20, %s2448_s14  ;;  %v1492_v27 = vrot.slane %v2168_v25, %v3026_v46  ;;  %v2171_v63 = vld.sshfl [vmem:[#allocation4 + $0x14] sm:$0x20 pattern:$0x75316420]  ;;  %v2413_v25 = vld [vmem:[%s3229_s5 + $0xc0] sm:$0xff]  }
 0x2c2   :  { %v1472_v28 = vrot.slane %v1465_v22, %v3026_v46  ;;  %v1547_v29 = vcombine.high %v2171_v63, %v2171_v63  ;;  %v2170_v34 = vld.sshfl [vmem:[#allocation4 + $0x14] sm:$0x2 pattern:$0x75316420]  ;;  %1984 = vmatpush1.bf16.msra.mxu0 %v2413_v25 }
 0x2c3   :  { %v1124_v31 = vpop.f32.mrb[12].mxu1  ;;  %v1493_v33 = vcombine.high %v1492_v27, %v1492_v27  ;;  %v1534_v40 = vrot.slane %v2170_v34, %v3026_v46  ;;  %v2169_v53 = vld.sshfl [vmem:[#allocation4 + $0x14] sm:$0x10 pattern:$0x75316420] }
 0x2c4   :  { %v1125_v35 = vadd.f32 %v3020_v0, %v1124_v31  ;;  %1473 = vrot.lane.b32.xlu1 %v1472_v28, %s2452_s4  ;;  %v2338_v38 = vpop.f32.mrb[13].mxu1  ;;  %v1554_v39 = vrot.slane %v1547_v29, %v3026_v46  ;;  %v1507_v61 = vcombine.high %v2169_v53, %v2169_v53 }
 0x2c5   :  { %v1127_v41 = vpop.f32.mrb[14].mxu1  ;;  %1494 = vrot.lane.b32.xlu0 %v1493_v33, %s2453_s29  ;;  %v1535_v14 = vcombine.high %v1534_v40, %v1534_v40 }
 0x2c6   :  { %v1144_v24 = vmax.f32 %v1125_v35, 0.0  ;;  %v1128_v54 = vadd.f32 %v3020_v0, %v1127_v41  ;;  %v2339_v23 = vpop.f32.mrb[15].mxu1  ;;  %v1555_v43 = vcombine.high %v1554_v39, %v1554_v39  ;;  %v1514_v22 = vrot.slane %v1507_v61, %v3026_v46 }
 0x2c7   :  { %1537 = vst.msk [vmem:[#allocation5 + $0x2] sm:$0x1] %vm1196_vm3, %v1535_v14 }
 0x2c8   :  { %v2229_v44 = vpack.c.bf16 %v1144_v24, %v1144_v24  ;;  %v1145_v45 = vmax.f32 %v1128_v54, 0.0 }
 0x2c9   :  { %1556 = vrot.lane.b32.xlu0 %v1555_v43, %s2443_s2 }
 0x2ca   :  { %1191 = vst.msk [vmem:[#allocation4 + $0x18] sm:$0xf] %vm1184_vm2, %v2229_v44  ;;  %v2230_v47 = vpack.c.bf16 %v1145_v45, %v1145_v45 }
 0x2cc   :  { %1192 = vst.msk [vmem:[#allocation4 + $0x1c] sm:$0xf] %vm1184_vm2, %v2230_v47 }
 0x2d1   :  { %v2172_v56 = vld.sshfl [vmem:[#allocation4 + $0x18] sm:$0x1 pattern:$0x75316420] }
 0x2d2   :  { %v1575_v49 = vrot.slane %v2172_v56, %v3026_v46  ;;  %v2173_v58 = vld.sshfl [vmem:[#allocation4 + $0x18] sm:$0x10 pattern:$0x75316420] }
 0x2d3   :  { %v1589_v59 = vcombine.high %v2173_v58, %v2173_v58  ;;  %v2174_v60 = vld.sshfl [vmem:[#allocation4 + $0x1c] sm:$0x1 pattern:$0x75316420]  ;;  %v2415_v58 = vld [vmem:[%s3231_s7 + $0x8] sm:$0xff]  }
 0x2d4   :  { %v1132_v62 = vpop.f32.mrb[16].mxu1  ;;  %1576 = vrot.lane.b32.xlu1 %v1575_v49, %s2445_s11  ;;  %v2175_v3 = vld.sshfl [vmem:[#allocation4 + $0x1c] sm:$0x10 pattern:$0x75316420]  ;;  %v1616_v8 = vrot.slane %v2174_v60, %v3026_v46  ;;  %v2414_v49 = vld [vmem:[%s3231_s7] sm:$0xff]  }
 0x2d5   :  { %v1133_v32 = vadd.f32 %v3020_v0, %v1132_v62  ;;  %v2342_v17 = vpop.f32.mrb[17].mxu1  ;;  %v1596_v2 = vrot.slane %v1589_v59, %v3026_v46  ;;  %v1630_v13 = vcombine.high %v2175_v3, %v2175_v3  ;;  %v2176_v4 = vld.sshfl [vmem:[#allocation4 + $0x1c] sm:$0x2 pattern:$0x75316420] }
 0x2d6   :  { %v1135_v5 = vpop.f32.mrb[18].mxu1  ;;  %v1657_v0 = vrot.slane %v2176_v4, %v3026_v46  ;;  %v2177_v6 = vld.sshfl [vmem:[#allocation4 + $0x1c] sm:$0x20 pattern:$0x75316420] }
 0x2d7   :  { %v1146_v48 = vmax.f32 %v1133_v32, 0.0  ;;  %v2343_v57 = vpop.f32.mrb[19].mxu1  ;;  %1597 = vrot.lane.b32.xlu0 %v1596_v2, %s2449_s22  ;;  %v1672_v19 = vcombine.high %v2177_v6, %v2177_v6  ;;  %v1637_v42 = vrot.slane %v1630_v13, %v3026_v46  ;;  %v2178_v59 = vld [vmem:[%s3230_s6] ss:$0 sm:$0xff]  ;;  %s2416_s6 = scalar_lea.vmem %s2085_s1, 32 }
 0x2d8   :  { %1617 = vrot.lane.b32.xlu1 %v1616_v8, %s2448_s14  ;;  %v1658_v20 = vcombine.high %v1657_v0, %v1657_v0  ;;  %p2417_p0 = scmp.ne.s32.totalorder %s2085_s1, %s2416_s6  ;;  %p2422_p2 = scmp.lt.s32.totalorder %s2416_s6, %s2416_s6 }
 0x2d9   :  { %v2231_v11 = vpack.c.bf16 %v1146_v48, %v1146_v48  ;;  %v1679_v16 = vrot.slane %v1672_v19, %v3026_v46 }
 0x2da   :  { %p2423_p3 = por %p2422_p2, %p2421_p1 }
 0x2db   :  { %1194 = vst.msk [vmem:[#allocation4 + $0x20] sm:$0x7] %vm1193_vm4, %v2231_v11  ;;  %1638 = vrot.lane.b32.xlu0 %v1637_v42, %s2452_s4  ;;  %v1680_v21 = vcombine.high %v1679_v16, %v1679_v16 }
 0x2dc   :  { %1659 = vrot.lane.b32.xlu1 %v1658_v20, %s2453_s29  ;;  %p2424_p4 = pnand %p2423_p3, %p2417_p0 }
 0x2df   :  { %1681 = vrot.lane.b32.xlu0 %v1680_v21, %s2454_s0 }
 0x2e0   :  { %1515 = vrot.lane.b32.xlu1 %v1514_v22, %s2454_s0 }
 0x2e2   :  { %v1685_v26 = vld [vmem:[#allocation4 + $0x20] sm:$0x1] }
 0x2e3   :  { %1686 = vst.msk [vmem:[#allocation5 + $0x3] sm:$0x1] %vm1196_vm3, %v1685_v26 }
 0x2f5   :  { %v1216_v12 = vpop.permute.xlu0 %1215 }
 0x2f6   :  { %1219 = vst.msk [vmem:[#allocation5] sm:$0x1] %vm1218_vm5, %v1216_v12  ;;  %v1238_v27 = vpop.permute.xlu1 %1237 }
 0x2f7   :  { %1241 = vst.msk [vmem:[#allocation5] sm:$0x1] %vm1240_vm6, %v1238_v27 }
 0x2f9   :  { %v1261_v63 = vpop.permute.xlu0 %1260 }
 0x2fa   :  { %1264 = vst.msk [vmem:[#allocation5] sm:$0x1] %vm1263_vm7, %v1261_v63  ;;  %v1282_v28 = vpop.permute.xlu1 %1281 }
 0x2fb   :  { %1285 = vst.msk [vmem:[#allocation5] sm:$0x1] %vm1284_vm8, %v1282_v28 }
 0x2fd   :  { %v1305_v29 = vpop.permute.xlu0 %1304 }
 0x2fe   :  { %1308 = vst.msk [vmem:[#allocation5] sm:$0x1] %vm1307_vm9, %v1305_v29 }
 0x313   :  { %v1326_v31 = vpop.permute.xlu1 %1325 }
 0x314   :  { %1329 = vst.msk [vmem:[#allocation5] sm:$0x1] %vm1328_vm10, %v1326_v31 }
 0x316   :  { %v1348_v33 = vpop.permute.xlu0 %1347 }
 0x317   :  { %1351 = vst.msk [vmem:[#allocation5] sm:$0x1] %vm1350_vm11, %v1348_v33 }
 0x319   :  { %v1390_v34 = vpop.permute.xlu1 %1389 }
 0x31a   :  { %1392 = vst.msk [vmem:[#allocation5 + $0x1] sm:$0x1] %vm1218_vm5, %v1390_v34  ;;  %v1411_v35 = vpop.permute.xlu0 %1410 }
 0x31b   :  { %1413 = vst.msk [vmem:[#allocation5 + $0x1] sm:$0x1] %vm1240_vm6, %v1411_v35 }
 0x31d   :  { %v1433_v38 = vpop.permute.xlu1 %1432 }
 0x31e   :  { %1435 = vst.msk [vmem:[#allocation5 + $0x1] sm:$0x1] %vm1263_vm7, %v1433_v38 }
 0x333   :  { %v1453_v39 = vpop.permute.xlu0 %1452 }
 0x334   :  { %1455 = vst.msk [vmem:[#allocation5 + $0x1] sm:$0x1] %vm1284_vm8, %v1453_v39 }
 0x336   :  { %v1474_v40 = vpop.permute.xlu1 %1473 }
 0x337   :  { %1476 = vst.msk [vmem:[#allocation5 + $0x1] sm:$0x1] %vm1307_vm9, %v1474_v40  ;;  %v1495_v41 = vpop.permute.xlu0 %1494 }
 0x338   :  { %1497 = vst.msk [vmem:[#allocation5 + $0x1] sm:$0x1] %vm1328_vm10, %v1495_v41 }
 0x33b   :  { %v1557_v24 = vpop.permute.xlu0 %1556 }
 0x33c   :  { %1559 = vst.msk [vmem:[#allocation5 + $0x2] sm:$0x1] %vm1218_vm5, %v1557_v24 }
 0x346   :  { %v1577_v54 = vpop.permute.xlu1 %1576 }
 0x347   :  { %1579 = vst.msk [vmem:[#allocation5 + $0x2] sm:$0x1] %vm1240_vm6, %v1577_v54 }
 0x349   :  { %v1598_v23 = vpop.permute.xlu0 %1597 }
 0x34a   :  { %1600 = vst.msk [vmem:[#allocation5 + $0x2] sm:$0x1] %vm1263_vm7, %v1598_v23  ;;  %v1618_v14 = vpop.permute.xlu1 %1617 }
 0x34b   :  { %1620 = vst.msk [vmem:[#allocation5 + $0x2] sm:$0x1] %vm1284_vm8, %v1618_v14 }
 0x34d   :  { %v1639_v43 = vpop.permute.xlu0 %1638 }
 0x34e   :  { %1641 = vst.msk [vmem:[#allocation5 + $0x2] sm:$0x1] %vm1307_vm9, %v1639_v43  ;;  %v1660_v36 = vpop.permute.xlu1 %1659 }
 0x34f   :  { %1662 = vst.msk [vmem:[#allocation5 + $0x2] sm:$0x1] %vm1328_vm10, %v1660_v36 }
 0x351   :  { %v1682_v44 = vpop.permute.xlu0 %1681 }
 0x352   :  { %1684 = vst.msk [vmem:[#allocation5 + $0x2] sm:$0x1] %vm1350_vm11, %v1682_v44  ;;  %v1516_v45 = vpop.permute.xlu1 %1515 }
 0x353   :  { %1518 = vst.msk [vmem:[#allocation5 + $0x1] sm:$0x1] %vm1350_vm11, %v1516_v45 }
 0x35a   :  { %v2179_v47 = vld.sshfl [vmem:[#allocation5] sm:$0x33 pattern:$0x75316420] }
 0x35b   :  { %v1753_v50 = vcombine.high %v2179_v47, %v2179_v47  ;;  %v1760_v51 = vrot.slane %v2179_v47, %v3026_v46 }
 0x35d   :  { %v1767_v52 = vrot.slane %v1753_v50, %v3026_v46  ;;  %v1768_v56 = vcombine.high %v1760_v51, %v1760_v51 }
 0x35f   :  { %v1769_v55 = vcombine.high %v1767_v52, %v1767_v52  ;;  %1959 = vmatprep.mubr.bf16.mxu1 %v1767_v52 }
 0x360   :  { %1960 = vmatmul.mubr.bf16.vlgmr.msra.gmra.mrb[20].mxu1 %v1760_v51 }
 0x361   :  { %2205 = vmatprep.mubr.msk.bf16.mxu0 %vm1923_vm12, %v1769_v55  ;;  %2348 = vmatprep.mubr.msk.bf16.mxu1 %vm2441_vm0, %v2440_v1  ;;  %vm2032_vm0 = vcmask 261120  }
 0x362   :  { %2000 = vmatmul.mubr.bf16.vlgmr.msra.gmra.mrb[28].mxu0 %v1768_v56  ;;  %2345 = vmatpush3.bf16.msra.mxu1 %v2414_v49 }
 0x363   :  { %2346 = vmatprep.subr.bf16.mxu1 %v2440_v1  ;;  %v2206_v1 = vld [vmem:[%s3232_s8] ss:$0 sm:$0xff] }
 0x366   :  { %2347 = vmatpush3.bf16.msra.mxu1 %v2415_v58 }
 0x433   :  { %v2269_v46 = vpop.f32.mrb[20].mxu1 }
 0x434   :  { %v2270_v18 = vpop.f32.mrb[21].mxu1 }
 0x435   :  { %v2271_v60 = vadd.f32 %v2270_v18, %v2269_v46  ;;  %v2272_v62 = vpop.f32.mrb[22].mxu1  ;;  %v2001_v37 = vpop.f32.mrb[28].mxu0 }
 0x436   :  { %v2273_v3 = vpop.f32.mrb[23].mxu1  ;;  %v2003_v32 = vpop.f32.mrb[29].mxu0 }
 0x437   :  { %v1962_v17 = vadd.f32 %v2271_v60, %v2178_v59  ;;  %v2004_v30 = vpop.f32.mrb[30].mxu0 }
 0x438   :  { %v2005_v2 = vpop.f32.mrb[31].mxu0 }
 0x439   :  { %v2002_v13 = vadd.f32 %v2001_v37, %v1962_v17 }
 0x43b   :  { %v2007_v4 = vmax.f32 %v2002_v13, 0.0 }
 0x43d   :  { %v2008_v5 = vpack.c.bf16 %v2007_v4, %v2007_v4 }
 0x43f   :  { %2349 = vmatmul.mubr.msk.bf16.vlgmr.msra.gmra.mrb[24].mxu1 %vm2032_vm0, %v2008_v5 }
 0x512   :  { %v2070_v7 = vpop.f32.mrb[24].mxu1 }
 0x513   :  { %v2071_v8 = vadd.f32 %v2206_v1, %v2070_v7  ;;  %v2350_v0 = vpop.f32.mrb[25].mxu1 }
 0x514   :  { %v2073_v6 = vpop.f32.mrb[26].mxu1 }
 0x515   :  { %v2351_v48 = vpop.f32.mrb[27].mxu1  ;;  %2077 = vst.msk [vmem:[#allocation6] sm:$0x3] %vm2076_vm13, %v2071_v8 }
 0x516   :  { %2427 = shalt.err (!%p2424_p4)
}
 0x517   :  { %s2428_s8 = scalar_lea.hbm %s3233_s9, 32 }
 0x518   :  { %p2429_p5 = scmp.ne.s32.totalorder %s3233_s9, %s2428_s8  ;;  %p2432_p6 = scmp.lt.u32.totalorder %s2428_s8, %s3233_s9 }
 0x51a   :  { %p2434_p7 = pnand %p2432_p6, %p2429_p5 }
 0x51c   :  { %2437 = shalt.err (!%p2434_p7)
}
 0x51d   :  { %2087 = dma.vmem_to_hbm [thread:$0]  %s2085_s1, 32, %s3233_s9, [#allocation7]  }
 0x51e   :  { %2438 = dma.done.wait [#allocation7], 32  }
 0x51f   :  { %2439 = vsyncadd [#allocation7], 4294967264 }
 0x520   :  { %2091 = vsyncpa [#allocation7], 1 }

</bundles_post_ra>
